<compile_context>
chip_gen: v7x
topology: tpu7x:2x2x1
jax: 0.10.0
libtpu: 0.0.40
codegen_flags: <defaults>
</compile_context>

<pallas_src>
import functools

import jax
import jax.numpy as jnp
from jax import lax
from jax.experimental import pallas as pl
from jax.experimental.pallas import tpu as pltpu

BN_EPS = 1e-5  # nn.BatchNorm1d default


def sup_head5_kernel(x_ref, w1_ref, w2_ref, o_ref, *, inv_batch):
    """One grid step = one tile of the 2048-wide hidden layer (per core slab).

    h    = x @ W1_tile                 (MXU, bf16 in / f32 acc)
    h    = BatchNorm1d(h)              (training-mode batch stats, gamma=1, beta=0)
    r    = relu(h)
    out += r @ W2_tile                 (MXU, accumulated in resident o_ref)
    """
    k = pl.program_id(1)

    @pl.when(k == 0)
    def _():
        o_ref[...] = jnp.zeros_like(o_ref)

    # First linear (bias omitted: cancelled exactly by the batch-mean subtract).
    h = jnp.dot(x_ref[...], w1_ref[...], preferred_element_type=jnp.float32)

    # BatchNorm1d, training-mode batch stats, single pass (E[h^2] - mean^2).
    # Zero-padded batch rows contribute 0 to both sums, so dividing by the
    # true batch size keeps the statistics exact.  Clamp the variance at 0 to
    # avoid NaN from catastrophic cancellation on near-constant features.
    mean = jnp.sum(h, axis=0, keepdims=True) * inv_batch
    ex2 = jnp.sum(h * h, axis=0, keepdims=True) * inv_batch
    var = jnp.maximum(ex2 - mean * mean, 0.0)
    h = (h - mean) * lax.rsqrt(var + BN_EPS)  # gamma=1, beta=0

    # ReLU.
    r = jnp.maximum(h, 0.0)

    # Second linear: accumulate partial products directly into the resident
    # per-core output slab (output block index is constant across k).
    o_ref[...] += jnp.dot(r.astype(w2_ref.dtype), w2_ref[...],
                          preferred_element_type=jnp.float32)


def _vmem_capacity_bytes():
    try:
        return int(pltpu.get_tpu_info().vmem_capacity_bytes)
    except Exception:
        return 128 * 1024 * 1024  # conservative default (v5e/v6e-class parts)


def _vmem_footprint_bytes(b_pad, dlen, tile_h, n_pad):
    """Estimate of all pipeline buffers + intermediates for one grid step."""
    w1 = 2 * dlen * tile_h * 2       # double-buffered bf16 W1 tile (dominant)
    x = 2 * b_pad * dlen * 2         # double-buffered bf16 x block
    w2 = 2 * tile_h * n_pad * 2      # double-buffered bf16 W2 tile
    out = 2 * b_pad * n_pad * 4      # f32 output slab (+ pipeline buffer)
    interm = 2 * b_pad * tile_h * 4  # f32 h / r intermediates
    return w1 + x + w2 + out + interm


def sup_head5_forward(x_nchw, w1, b1, w2, b2):
    """x_nchw: [B, C, H, W]. Returns logits [B, gt_k] (float32)."""
    B = x_nchw.shape[0]
    # Trunk stand-in: penultimate features = flattened input.
    feats = x_nchw.reshape(B, -1)
    dlen = feats.shape[1]
    hidden = w1.shape[1]
    gt_k = w2.shape[1]

    # b1 is mathematically cancelled by training-mode BN (gamma=1, beta=0);
    # kept in the signature for interface fidelity only.
    del b1

    # --- host-side layout prep ---
    # bf16 streaming operands (halves HBM bytes; MXU-native on all generations).
    feats_bf16 = feats.astype(jnp.bfloat16)
    w1_bf16 = w1.astype(jnp.bfloat16)
    w2_bf16 = w2.astype(jnp.bfloat16)

    # Pad the batch to a multiple of 16 sublanes (bf16 packs 16 rows per vreg;
    # zero rows keep the BN statistics exact, see kernel).
    b_pad = max(16, ((B + 15) // 16) * 16)
    if b_pad != B:
        feats_bf16 = jnp.pad(feats_bf16, ((0, b_pad - B), (0, 0)))

    # Pad gt_k to a lane-dense multiple of 128; slice real columns afterwards.
    n_pad = max(128, ((gt_k + 127) // 128) * 128)
    if n_pad != gt_k:
        w2_bf16 = jnp.pad(w2_bf16, ((0, 0), (0, n_pad - gt_k)))

    # --- generation-aware VMEM budgeting ---
    vmem_cap = _vmem_capacity_bytes()
    vmem_limit = (5 * vmem_cap) // 8          # ~40 MiB on v7x, ~80 MiB on v5e/v6e
    budget = (7 * vmem_limit) // 10           # headroom for Mosaic scratch

    # Hidden-tile size: cap at 512 so the reduction grid has >= 4 steps
    # (DMA/compute overlap), then shrink while the full pipeline footprint
    # exceeds the budget.
    tile_h = min(hidden, 512)
    while tile_h > 128 and _vmem_footprint_bytes(b_pad, dlen, tile_h, n_pad) > budget:
        tile_h //= 2
    assert hidden % tile_h == 0
    n_tiles = hidden // tile_h

    # Split the hidden tiles across (up to) two TensorCores; each core owns a
    # private partial output slab summed afterwards.
    n_split = 2 if n_tiles % 2 == 0 else 1
    tiles_per_core = n_tiles // n_split

    # Pre-reshape W1 so each hidden tile is one contiguous (dlen, tile_h) slab.
    w1_tiled = w1_bf16.reshape(dlen, n_tiles, tile_h).transpose(1, 0, 2)

    kernel = functools.partial(sup_head5_kernel, inv_batch=1.0 / B)

    partials = pl.pallas_call(
        kernel,
        out_shape=jax.ShapeDtypeStruct((n_split, b_pad, n_pad), jnp.float32),
        grid_spec=pltpu.PrefetchScalarGridSpec(
            num_scalar_prefetch=0,
            grid=(n_split, tiles_per_core),
            in_specs=[
                # x: constant block (DMA'd once, revisited across the grid).
                pl.BlockSpec((b_pad, dlen), lambda c, k: (0, 0)),
                # W1 tile: contiguous slab per hidden tile.
                pl.BlockSpec((None, dlen, tile_h),
                             lambda c, k: (c * tiles_per_core + k, 0, 0)),
                # W2 tile: contiguous row strip.
                pl.BlockSpec((tile_h, n_pad),
                             lambda c, k: (c * tiles_per_core + k, 0)),
            ],
            # Per-core resident accumulator slab.
            out_specs=pl.BlockSpec((None, b_pad, n_pad), lambda c, k: (c, 0, 0)),
        ),
        compiler_params=pltpu.CompilerParams(
            dimension_semantics=("parallel", "arbitrary"),
            vmem_limit_bytes=vmem_limit,
        ),
    )(feats_bf16, w1_tiled, w2_bf16)

    # Combine the per-core partial slabs, slice the real rows/columns, add b2.
    return partials.sum(axis=0)[:B, :gt_k] + b2.astype(jnp.float32)


def reference_forward(x_nchw, w1, b1, w2, b2):
    B = x_nchw.shape[0]
    feats = x_nchw.reshape(B, -1).astype(jnp.float32)
    h = feats @ w1 + b1
    mean = jnp.mean(h, axis=0, keepdims=True)
    var = jnp.mean((h - mean) ** 2, axis=0, keepdims=True)
    h = (h - mean) / jnp.sqrt(var + BN_EPS)
    r = jnp.maximum(h, 0.0)
    return r @ w2 + b2


if __name__ == "__main__":
    # Small deterministic example: x [4, 4, 16, 16]  =>  dlen = 4*16*16 = 1024
    B, C, H, W = 4, 4, 16, 16
    dlen = C * H * W
    hidden = 2048
    gt_k = 10

    key = jax.random.PRNGKey(0)
    kx, kw1, kw2 = jax.random.split(key, 3)

    x = jax.random.normal(kx, (B, C, H, W), dtype=jnp.float32)

    # Head init matching the module: Linear weights ~ N(0, 0.01), biases 0,
    # BatchNorm gamma=1 / beta=0 (identity affine, folded into the kernel).
    # Weights stored as (in, out) so the kernel does x @ W.
    w1 = 0.01 * jax.random.normal(kw1, (dlen, hidden), dtype=jnp.float32)
    b1 = jnp.zeros((hidden,), dtype=jnp.float32)
    w2 = 0.01 * jax.random.normal(kw2, (hidden, gt_k), dtype=jnp.float32)
    b2 = jnp.zeros((gt_k,), dtype=jnp.float32)

    out = sup_head5_forward(x, w1, b1, w2, b2)
    out = jax.block_until_ready(out)

    ref = reference_forward(x, w1, b1, w2, b2)
    assert out.shape == (B, gt_k)
    # bf16 streaming operands -> looser tolerance than pure-f32.
    assert jnp.allclose(out, ref, atol=3e-2, rtol=3e-2), "mismatch vs reference"

    print("KERNEL_OK")
</pallas_src>

<mosaic_0001>
module attributes {stable_mosaic.version = 11 : i64} {
  func.func @sup_head5_kernel(%arg0: i32, %arg1: i32, %arg2: memref<16x1024xbf16, #tpu.memory_space<vmem>>, %arg3: memref<1x1024x512xbf16, #tpu.memory_space<vmem>>, %arg4: memref<512x128xbf16, #tpu.memory_space<vmem>>, %arg5: memref<1x16x128xf32, #tpu.memory_space<vmem>>) attributes {dimension_semantics = [#tpu.dimension_semantics<parallel>, #tpu.dimension_semantics<arbitrary>], iteration_bounds = array<i64: 2, 2>, scalar_prefetch = 0 : i64, scratch_operands = 0 : i64, tpu.core_type = #tpu.core_type<tc>, window_params = [{pipeline_mode = #tpu.pipeline_mode<synchronous>, transform_indices = @transform_0, window_bounds = array<i64: 16, 1024>}, {transform_indices = @transform_1, window_bounds = array<i64: 1, 1024, 512>}, {transform_indices = @transform_2, window_bounds = array<i64: 512, 128>}, {transform_indices = @transform_3, window_bounds = array<i64: 1, 16, 128>}]} {
    %c0_i32 = arith.constant 0 : i32
    %0 = arith.cmpi eq, %arg1, %c0_i32 : i32
    %1 = arith.extui %0 : i1 to i32
    %c0_i32_0 = arith.constant 0 : i32
    %2 = arith.cmpi ne, %1, %c0_i32_0 : i32
    scf.if %2 {
      %cst_21 = arith.constant 0.000000e+00 : f32
      %38 = vector.broadcast %cst_21 : f32 to vector<16x128xf32>
      %c0_22 = arith.constant 0 : index
      %c0_23 = arith.constant 0 : index
      %c0_24 = arith.constant 0 : index
      %39 = vector.load %arg5[%c0_22, %c0_23, %c0_24] : memref<1x16x128xf32, #tpu.memory_space<vmem>>, vector<1x16x128xf32>
      %40 = vector.shape_cast %39 : vector<1x16x128xf32> to vector<16x128xf32>
      %41 = vector.shape_cast %38 : vector<16x128xf32> to vector<1x16x128xf32>
      tpu.vector_store %arg5[%c0_22, %c0_23, %c0_24], %41 {strides = array<i32>} : memref<1x16x128xf32, #tpu.memory_space<vmem>>, vector<1x16x128xf32>,
    } else {
    }
    %c0 = arith.constant 0 : index
    %c0_1 = arith.constant 0 : index
    %3 = vector.load %arg2[%c0, %c0_1] : memref<16x1024xbf16, #tpu.memory_space<vmem>>, vector<16x1024xbf16>
    %c0_2 = arith.constant 0 : index
    %c0_3 = arith.constant 0 : index
    %c0_4 = arith.constant 0 : index
    %4 = vector.load %arg3[%c0_2, %c0_3, %c0_4] : memref<1x1024x512xbf16, #tpu.memory_space<vmem>>, vector<1x1024x512xbf16>
    %5 = vector.shape_cast %4 : vector<1x1024x512xbf16> to vector<1024x512xbf16>
    %cst = arith.constant dense<0.000000e+00> : vector<16x512xf32>
    %6 = tpu.matmul %3, %5, %cst {dimension_numbers = #tpu.dot_dimension_numbers<[1], [0], [0], [1], [0, 0, 1, 1], [], []>} : vector<16x1024xbf16>, vector<1024x512xbf16>, vector<16x512xf32> -> vector<16x512xf32>
    %cst_5 = arith.constant dense<0.000000e+00> : vector<512xf32>
    %7 = vector.multi_reduction <add>, %6, %cst_5 [0] : vector<16x512xf32> to vector<512xf32>
    %8 = vector.shape_cast %7 : vector<512xf32> to vector<1x512xf32>
    %cst_6 = arith.constant 2.500000e-01 : f32
    %9 = vector.broadcast %cst_6 : f32 to vector<1x512xf32>
    %10 = arith.mulf %8, %9 : vector<1x512xf32>
    %11 = arith.mulf %6, %6 : vector<16x512xf32>
    %cst_7 = arith.constant dense<0.000000e+00> : vector<512xf32>
    %12 = vector.multi_reduction <add>, %11, %cst_7 [0] : vector<16x512xf32> to vector<512xf32>
    %13 = vector.shape_cast %12 : vector<512xf32> to vector<1x512xf32>
    %cst_8 = arith.constant 2.500000e-01 : f32
    %14 = vector.broadcast %cst_8 : f32 to vector<1x512xf32>
    %15 = arith.mulf %13, %14 : vector<1x512xf32>
    %16 = arith.mulf %10, %10 : vector<1x512xf32>
    %17 = arith.subf %15, %16 : vector<1x512xf32>
    %cst_9 = arith.constant 0.000000e+00 : f32
    %18 = vector.broadcast %cst_9 : f32 to vector<1x512xf32>
    %19 = arith.maximumf %17, %18 : vector<1x512xf32>
    %20 = vector.broadcast %10 : vector<1x512xf32> to vector<16x512xf32>
    %21 = arith.subf %6, %20 : vector<16x512xf32>
    %cst_10 = arith.constant 9.99999974E-6 : f32
    %22 = vector.broadcast %cst_10 : f32 to vector<1x512xf32>
    %23 = arith.addf %19, %22 : vector<1x512xf32>
    %24 = math.rsqrt %23 : vector<1x512xf32>
    %25 = vector.broadcast %24 : vector<1x512xf32> to vector<16x512xf32>
    %26 = arith.mulf %21, %25 : vector<16x512xf32>
    %cst_11 = arith.constant 0.000000e+00 : f32
    %27 = vector.broadcast %cst_11 : f32 to vector<16x512xf32>
    %28 = arith.maximumf %26, %27 : vector<16x512xf32>
    %c0_12 = arith.constant 0 : index
    %c0_13 = arith.constant 0 : index
    %c0_14 = arith.constant 0 : index
    %29 = vector.load %arg5[%c0_12, %c0_13, %c0_14] : memref<1x16x128xf32, #tpu.memory_space<vmem>>, vector<1x16x128xf32>
    %30 = vector.shape_cast %29 : vector<1x16x128xf32> to vector<16x128xf32>
    %31 = arith.truncf %28 : vector<16x512xf32> to vector<16x512xbf16>
    %c0_15 = arith.constant 0 : index
    %c0_16 = arith.constant 0 : index
    %32 = vector.load %arg4[%c0_15, %c0_16] : memref<512x128xbf16, #tpu.memory_space<vmem>>, vector<512x128xbf16>
    %cst_17 = arith.constant dense<0.000000e+00> : vector<16x128xf32>
    %33 = tpu.matmul %31, %32, %cst_17 {dimension_numbers = #tpu.dot_dimension_numbers<[1], [0], [0], [1], [0, 0, 1, 1], [], []>} : vector<16x512xbf16>, vector<512x128xbf16>, vector<16x128xf32> -> vector<16x128xf32>
    %34 = arith.addf %30, %33 : vector<16x128xf32>
    %c0_18 = arith.constant 0 : index
    %c0_19 = arith.constant 0 : index
    %c0_20 = arith.constant 0 : index
    %35 = vector.load %arg5[%c0_18, %c0_19, %c0_20] : memref<1x16x128xf32, #tpu.memory_space<vmem>>, vector<1x16x128xf32>
    %36 = vector.shape_cast %35 : vector<1x16x128xf32> to vector<16x128xf32>
    %37 = vector.shape_cast %34 : vector<16x128xf32> to vector<1x16x128xf32>
    tpu.vector_store %arg5[%c0_18, %c0_19, %c0_20], %37 {strides = array<i32>} : memref<1x16x128xf32, #tpu.memory_space<vmem>>, vector<1x16x128xf32>,
    return
  }
  func.func @transform_0(%arg0: i32, %arg1: i32) -> (i32, i32) {
    %c0_i32 = arith.constant 0 : i32
    %c0_i32_0 = arith.constant 0 : i32
    %c0_i32_1 = arith.constant 0 : i32
    return %c0_i32, %c0_i32_0 : i32, i32
  }
  func.func @transform_1(%arg0: i32, %arg1: i32) -> (i32, i32, i32) {
    %c2_i32 = arith.constant 2 : i32
    %0 = arith.muli %arg0, %c2_i32 : i32
    %1 = arith.addi %0, %arg1 : i32
    %c0_i32 = arith.constant 0 : i32
    %c0_i32_0 = arith.constant 0 : i32
    %c0_i32_1 = arith.constant 0 : i32
    return %1, %c0_i32, %c0_i32_0 : i32, i32, i32
  }
  func.func @transform_2(%arg0: i32, %arg1: i32) -> (i32, i32) {
    %c2_i32 = arith.constant 2 : i32
    %0 = arith.muli %arg0, %c2_i32 : i32
    %1 = arith.addi %0, %arg1 : i32
    %c0_i32 = arith.constant 0 : i32
    %c0_i32_0 = arith.constant 0 : i32
    return %1, %c0_i32 : i32, i32
  }
  func.func @transform_3(%arg0: i32, %arg1: i32) -> (i32, i32, i32) {
    %c0_i32 = arith.constant 0 : i32
    %c0_i32_0 = arith.constant 0 : i32
    %c0_i32_1 = arith.constant 0 : i32
    return %arg0, %c0_i32, %c0_i32_0 : i32, i32, i32
  }
}

</mosaic_0001>

<bundles_post_ra>
// kernel: tpu_custom_call.1
= control target key start
LH: loop header
LB: loop body
LE: loop exit
PB: predicated region body
PF: predicated region fallthrough
CT: control target
= control target key end

     0   :  { %s4688_s0 = inlined_call_operand.hbm [shape: bf16[16,1024], index: 0, kind: input, shape index: {}]   ;;  %s4689_s1 = inlined_call_operand.hbm [shape: bf16[4,1024,512], index: 1, kind: input, shape index: {}]   ;;  %s4690_s2 = inlined_call_operand.hbm [shape: bf16[2048,128], index: 2, kind: input, shape index: {}]   ;;  %s4691_s3 = inlined_call_operand.hbm [shape: f32[2,16,128], index: 3, kind: output, shape index: {}]  }
   0x1   :  { %4705 = sst [smem:[#allocation18_spill]] %s4689_s1 }
   0x2   :  { %4706 = sst [smem:[#allocation19_spill]] %s4691_s3 }
   0x3   :  { %8 = vsyncpa [#allocation3], 0 }
   0x4   :  { %9 = vsyncpa [#allocation6], 0 }
   0x5   :  { %11 = vsyncpa [#allocation6 + $0x1], 0 }
   0x6   :  { %12 = vsyncpa [#allocation4], 0 }
   0x7   :  { %14 = vsyncpa [#allocation4 + $0x1], 0  ;;  %s3998_s12 = smov 0   ;;  %s4000_s13 = smov 0  }
   0x8   :  { %s4002_s14 = smov 0   ;;  %s4004_s15 = smov 0  }
   0x9   :  { %s4006_s16 = smov 0   ;;  %s4008_s17 = smov 0  }
   0xa   :  { %s4010_s18 = smov 0   ;;  %s4012_s19 = smov 0  }
   0xb   :  { %s4014_s20 = smov 0   ;;  %s4016_s21 = smov 0  }
   0xc   :  { %s4018_s22 = smov 0  }
   0xd LB: > { %4707 = sst [smem:[#allocation12_spill]] %s3943_s17  ;;  %s29_s23 = sadd.s32 1, %s3955_s20  ;;  %s3963_s22 = sphi %s4018_s22, %s20_s22   ;;  %s3959_s21 = sphi %s4016_s21, %s4737_s21   ;;  %s3955_s20 = sphi %s4014_s20, %s4736_s20   ;;  %s3951_s19 = sphi %s4012_s19, %s4735_s19   ;;  %s3947_s18 = sphi %s4010_s18, %s4734_s18   ;;  %s3943_s17 = sphi %s4008_s17, %s4733_s17   ;;  %s3939_s16 = sphi %s4006_s16, %s4742_s16   ;;  %s3935_s15 = sphi %s4004_s15, %s4741_s15   ;;  %s3931_s14 = sphi %s4002_s14, %s4740_s14   ;;  %s3927_s13 = sphi %s4000_s13, %s4739_s13   ;;  %s3923_s12 = sphi %s3998_s12, %s4738_s12  }
   0xe   : > { %4708 = sst [smem:[#allocation13_spill]] %s3955_s20  ;;  %s32_s24 = sadd.s32 1, %s3959_s21 }
   0xf   : > { %4709 = sst [smem:[#allocation14_spill]] %s3959_s21  ;;  %p30_p0 = scmp.ge.s32.totalorder %s29_s23, 2 }
  0x10   : > { %s2805_s25 = sshll.u32 %s3959_s21, 1  ;;  %s64_s27 = sadd.s32 1, %s3943_s17 }
  0x11   : > { %s4057_s26 = sadd.s32 %s3955_s20, %s2805_s25  ;;  %s4744_s23 = smov (%p30_p0, %s29_s23), 0 }
  0x12   : > { %4710 = sst [smem:[#allocation15_spill]] %s4744_s23  ;;  %s4746_s24 = smov (!%p30_p0, %s32_s24), %s3959_s21 }
  0x13   : > { %p71_p1 = scmp.ne.s32.totalorder %s3943_s17, %s3939_s16  ;;  %p72_p2 = scmp.eq.s32.totalorder %s3963_s22, 0 }
  0x14   : > { %p34_p3 = scmp.ge.s32.totalorder %s4746_s24, 2  ;;  %p3224_p5 = scmp.lt.s32.totalorder %s3963_s22, 4 }
  0x15   : > { %p4066_p4 = por %p72_p2, %p71_p1  ;;  %s170_s29 = sand.u32 1, %s3963_s22  }
  0x16   : > { %s4748_s24 = smov (%p34_p3, %s4746_s24), 0  ;;  %s172_s30 = sand.u32 1, %s3943_s17  }
  0x17   : > { %4712 = sst [smem:[#allocation16_spill]] %s4748_s24  ;;  %s2806_s4 = sshll.u32 %s4748_s24, 1 }
  0x18   : > { %s117_s5 = ssub.s32 %s3959_s21, %s4748_s24  ;;  %s60_s6 = sadd.s32 %s2806_s4, %s4744_s23 }
  0x19   : > { %p4079_p6 = scmp.eq.s32.totalorder %s117_s5, 0  ;;  %s61_s8 = ssub.s32 %s4057_s26, %s60_s6 }
  0x1a   : > { %p62_p7 = scmp.eq.s32.totalorder %s61_s8, 0  ;;  %s2812_s9 = sshll.u32 %s172_s30, 11 }
  0x1b   : > { %s3127_s10 = sshll.u32 %s4057_s26, 15  ;;  %s4715_s1 = sld [smem:[#allocation18_spill]] }
  0x1c   : > { %s4086_s11 = scalar_select %p62_p7, %s3943_s17, %s64_s27  }
  0x1d   : > { %s174_s4 = scalar_lea.vmem [#allocation5], %s2812_s9  ;;  %p4099_p8 = pnand %p3224_p5, %p4066_p4 }
  0x1e   : > { %4714 = sst [smem:[#allocation17_spill]] %s4086_s11  ;;  %s183_s5 = sshll.u32 %s174_s4, 4  ;;  %s4093_s5 = int_to_ptr.vmem [resolvable:$true] %s183_s5 }
  0x1f   : > { %s4716_s6 = scalar_select %p4099_p8, 1, 0 }
  0x20   : > { %s4103_s27 = sshll.u32 %s172_s30, 8  ;;  %s4105_s20 = scalar_lea.sflag [#allocation6], %s170_s29 }
  0x21   : > { %s4091_s3 = scalar_lea.hbm %s4715_s1, %s3127_s10  ;;  %p4699_p10 = pneg %p4099_p8 }
  0x22   : > { %s3749_s8 = scalar_lea.hbm %s4091_s3, 32768  ;;  %s3754_s10 = scalar_lea.hbm %s4715_s1, 131072 }
  0x23   : > { %p3750_p9 = scmp.ne.s32.totalorder %s4091_s3, %s3749_s8  ;;  %p3755_p13 = scmp.lt.u32.totalorder %s4091_s3, %s4715_s1 }
  0x24   : > { %p3756_p0 = scmp.lt.u32.totalorder %s3754_s10, %s3749_s8  ;;  %p3758_p2 = scmp.lt.u32.totalorder %s3749_s8, %s4091_s3 }
  0x25   : > { %p3752_p11 = pnand %p4699_p10, %p3750_p9 }
  0x26   : > { %p3757_p1 = por %p3756_p0, %p3755_p13 }
  0x27   : > { %p3753_p12 = pneg %p3752_p11 }
  0x28   : > { %p3759_p3 = por %p3758_p2, %p3757_p1 }
  0x2a   : > { %p3760_p4 = pnand %p3759_p3, %p3753_p12 }
  0x2c   : > { %3763 = shalt.err (!%p3760_p4)
}
  0x2d   : > { %s3764_s29 = scalar_lea.vmem %s4093_s5, 32768  ;;  %s3965_s30 = smov [#allocation5]  }
  0x2e   : > { %p3765_p5 = scmp.ne.s32.totalorder %s4093_s5, %s3764_s29  ;;  %s3769_s28 = sshll.u32 %s3965_s30, 4  ;;  %s3770_s28 = int_to_ptr.vmem [resolvable:$false] %s3769_s28 }
  0x2f   : > { %s3771_s9 = scalar_lea.vmem %s3770_s28, 65536  ;;  %p3772_p11 = scmp.lt.s32.totalorder %s4093_s5, %s3770_s28 }
  0x30   : > { %p3767_p7 = pnand %p3765_p5, %p4699_p10  ;;  %p3773_p13 = scmp.lt.s32.totalorder %s3771_s9, %s3764_s29 }
  0x32   : > { %p3768_p9 = pneg %p3767_p7  ;;  %p3774_p0 = por %p3773_p13, %p3772_p11 }
  0x34   : > { %p3775_p1 = pnand %p3774_p0, %p3768_p9 }
  0x36   : > { %3778 = shalt.err (!%p3775_p1)
}
  0x37   : > { %s3966_s8 = smov 256   ;;  %s3967_s10 = smov 16  }
  0x38   : > { %3215 = dma.hbm_to_vmem [thread:$0]  (!%p4099_p8), %s4091_s3, 32768, %s4093_s5, %s4105_s20, %s3966_s8, %s3966_s8, %s3967_s10  }
  0x39   : > { %s197_s25 = scalar_lea.vmem [#allocation7], %s4103_s27  ;;  %s4135_s29 = sadd.s32 4294967295, %s3963_s22  }
  0x3a   : > { %s206_s4 = sshll.u32 %s197_s25, 4  ;;  %s2804_s30 = sadd.s32 4294967294, %s3963_s22   ;;  %s4175_s4 = int_to_ptr.vmem [resolvable:$true] %s206_s4 }
  0x3b   : > { %p77_p12 = scmp.ne.s32.totalorder %s3939_s16, %s3935_s15  ;;  %p4698_p2 = scmp.eq.s32.totalorder %s4135_s29, 0 }
  0x3c   : > { %s120_s28 = sadd.s32 1, %s3931_s14  ;;  %p130_p3 = scmp.ne.s32.totalorder %s3931_s14, %s3927_s13 }
  0x3d   : > { %p4146_p4 = por %p4698_p2, %p77_p12  ;;  %p131_p5 = scmp.eq.s32.totalorder %s4135_s29, 3 }
  0x3e   : > { %s4154_s3 = scalar_select %p4079_p6, %s3931_s14, %s120_s28  }
  0x3f   : > { %s4717_s9 = scalar_select %p4146_p4, 1, 0 }
  0x40   : > { %p4156_p7 = por %p131_p5, %p130_p3  ;;  %p136_p9 = scmp.ne.s32.totalorder %s3927_s13, %s3923_s12 }
  0x41   : > { %p137_p11 = scmp.eq.s32.totalorder %s2804_s30, 3  ;;  %p2809_p13 = scmp.ge.s32.totalorder %s3963_s22, 1 }
  0x42   : > { %s4718_s5 = scalar_select %p4156_p7, 1, 0 }
  0x43   : > { %p144_p0 = scmp.lt.s32.totalorder %s3963_s22, 5  ;;  %p4164_p1 = por %p137_p11, %p136_p9 }
  0x44   : > { %s3968_s7 = smov [#allocation2]   ;;  %s3128_s10 = sshll.u32 %s4057_s26, 12 }
  0x45   : > { %s4719_s15 = scalar_select %p4164_p1, 1, 0 }
  0x46   : > { %p4168_p12 = pnand %p2809_p13, %p144_p0  ;;  %s156_s8 = sshll.u32 %s3968_s7, 4  ;;  %s157_s8 = int_to_ptr.vmem [resolvable:$true] %s156_s8 }
  0x47   : > { %s4186_s1 = scalar_lea.hbm %s4690_s2, %s3128_s10  ;;  %s3779_s7 = scalar_lea.hbm %s4688_s0, 1024 }
  0x48   : > { %s4720_s27 = scalar_select %p4168_p12, 1, 0 }
  0x49   : > { %p3208_p6 = pneg %p4168_p12  ;;  %p3780_p5 = scmp.ne.s32.totalorder %s4688_s0, %s3779_s7 }
  0x4a   : > { %p3786_p0 = scmp.lt.u32.totalorder %s3779_s7, %s4688_s0 }
  0x4b   : > { %p4179_p3 = pnand %p3208_p6, %p4698_p2 }
  0x4d   : > { %p3781_p9 = pneg %p4179_p3 }
  0x4f   : > { %p3782_p11 = pnand %p3781_p9, %p3780_p5 }
  0x51   : > { %p3783_p13 = pneg %p3782_p11 }
  0x53   : > { %p3788_p6 = pnand %p3786_p0, %p3783_p13 }
  0x55   : > { %3791 = shalt.err (!%p3788_p6)
}
  0x56   : > { %s3792_s10 = scalar_lea.vmem %s157_s8, 1024  ;;  %p3800_p7 = scmp.lt.s32.totalorder %s157_s8, %s157_s8 }
  0x57   : > { %p3793_p2 = scmp.ne.s32.totalorder %s157_s8, %s3792_s10  ;;  %p3801_p4 = scmp.lt.s32.totalorder %s3792_s10, %s3792_s10 }
  0x59   : > { %p3795_p10 = pnand %p3793_p2, %p3781_p9  ;;  %p3802_p12 = por %p3801_p4, %p3800_p7 }
  0x5b   : > { %p3796_p1 = pneg %p3795_p10 }
  0x5d   : > { %p3803_p8 = pnand %p3802_p12, %p3796_p1 }
  0x5f   : > { %3806 = shalt.err (!%p3803_p8)
}
  0x60   : > { %s3969_s21 = smov 512   ;;  %s3970_s17 = smov 32  }
  0x61   : > { %3211 = dma.hbm_to_vmem [thread:$0]  (!%p4179_p3), %s4688_s0, 1024, %s157_s8, [#allocation3], %s3969_s21, %s3969_s21, %s3970_s17  }
  0x62   : > { %s3807_s11 = scalar_lea.hbm %s4186_s1, 4096  ;;  %p4722_p2 = scmp.ne.s32.totalorder %s4716_s6, 0 }
  0x63   : > { %p3808_p10 = scmp.ne.s32.totalorder %s4186_s1, %s3807_s11  ;;  %s3812_s7 = scalar_lea.hbm %s4690_s2, 16384 }
  0x64   : > { %p4723_p5 = pneg %p4722_p2  ;;  %p3813_p8 = scmp.lt.u32.totalorder %s4186_s1, %s4690_s2 }
  0x65   : > { %p3814_p1 = scmp.lt.u32.totalorder %s3812_s7, %s3807_s11  ;;  %p3816_p9 = scmp.lt.u32.totalorder %s3807_s11, %s4186_s1 }
  0x66   : > { %p3810_p4 = pnand %p3808_p10, %p4723_p5 }
  0x67   : > { %p3815_p12 = por %p3814_p1, %p3813_p8 }
  0x68   : > { %p3811_p7 = pneg %p3810_p4 }
  0x69   : > { %p3817_p11 = por %p3816_p9, %p3815_p12 }
  0x6b   : > { %p3818_p13 = pnand %p3817_p11, %p3811_p7 }
  0x6d   : > { %3821 = shalt.err (!%p3818_p13)
}
  0x6e   : > { %s3822_s8 = scalar_lea.vmem %s4175_s4, 4096  ;;  %p4724_p0 = pmov %p4723_p5 }
  0x6f   : > { %p3823_p3 = scmp.ne.s32.totalorder %s4175_s4, %s3822_s8  ;;  %s3971_s25 = smov [#allocation7]  }
  0x70   : > { %s3827_s21 = sshll.u32 %s3971_s25, 4  ;;  %s3828_s21 = int_to_ptr.vmem [resolvable:$false] %s3827_s21 }
  0x71   : > { %p3825_p6 = pnand %p3823_p3, %p4724_p0  ;;  %s3829_s17 = scalar_lea.vmem %s3828_s21, 8192 }
  0x72   : > { %p3830_p5 = scmp.lt.s32.totalorder %s4175_s4, %s3828_s21  ;;  %p3831_p4 = scmp.lt.s32.totalorder %s3829_s17, %s3822_s8 }
  0x73   : > { %p3826_p10 = pneg %p3825_p6 }
  0x74   : > { %p3832_p8 = por %p3831_p4, %p3830_p5 }
  0x76   : > { %p3833_p1 = pnand %p3832_p8, %p3826_p10 }
  0x78   : > { %3836 = shalt.err (!%p3833_p1)
}
  0x79   : > { %s3972_s23 = smov 64   ;;  %s3973_s24 = smov 4  }
  0x7a   : > { %3218 = dma.hbm_to_vmem [thread:$0]  (!%p4722_p2), %s4186_s1, 4096, %s4175_s4, %s4105_s20, %s3972_s23, %s3972_s23, %s3973_s24  }
  0x7b   : > { %p4725_p7 = scmp.ne.s32.totalorder %s4720_s27, 0 }
  0x7c   : > { %p4726_p12 = scmp.eq.s32.totalorder (!%p4725_p7), %s4135_s29, 0 }
  0x7d   : > { %218 = sbr.rel (%p4725_p7) target bundleno = 901 (0x385), region = 32 }
  0x84   : > { %3910 = dma.done.wait (%p4726_p12), [#allocation3], 1024   ;;  %p4727_p9 = pmov %p4726_p12 }
  0x85   : > { %s224_s11 = sand.u32 1, %s4135_s29   ;;  %s226_s30 = sand.u32 1, %s3939_s16  }
  0x86   : > { %3912 = vsyncadd (%p4727_p9), [#allocation3], 4294966272  ;;  %s2822_s28 = sshll.u32 %s226_s30, 11  ;;  %s225_s7 = scalar_lea.sflag [#allocation6], %s224_s11 }
  0x87   : > { %s4236_s26 = scalar_lea.vmem [#allocation5], %s2822_s28  ;;  %p4728_p11 = scmp.ne.s32.totalorder %s4717_s9, 0 }
  0x89   : > { %3914 = dma.done.wait (%p4728_p11), %s225_s7, 36864  }
  0x8a   : > { %3916 = vsyncadd (%p4728_p11), %s225_s7, 4294930432  ;;  %s2823_s1 = sshll.u32 %s226_s30, 8  ;;  %s262_s6 = sand.u32 1, %s3927_s13  }
  0x8b   : > { %s2824_s20 = sshll.u32 %s262_s6, 4  ;;  %s4245_s4 = scalar_lea.vmem [#allocation7], %s2823_s1 }
  0x8c   : > { %s4247_s27 = scalar_lea.vmem [#allocation8], %s2824_s20  ;;  %p2825_p2 = scmp.ne.s32.totalorder %s3947_s18, 0 }
  0x8d   : > { %v3974_v0 = vmov (!%p2825_p2), 0.0  }
  0x8e   : > { %274 = sbr.rel (%p2825_p2) target bundleno = 149 (0x95), region = 48  ;;  %275 = vst [vmem:[%s4247_s27] sm:$0xff] (!%p2825_p2), %v3974_v0  ;;  %276 = vst [vmem:[%s4247_s27 + $0x8] sm:$0xff] (!%p2825_p2), %v3974_v0 }
  0x95 PF: > { %v3325_v1 = vld [vmem:[%s4236_s26 + $0x4] ss:$16 sps:$4 sm:$0xff]   ;;  %v3327_v2 = vld [vmem:[%s4236_s26 + $0xc] ss:$16 sps:$4 sm:$0xff]   ;;  %v3329_v3 = vld [vmem:[%s4236_s26] ss:$16 sps:$4 sm:$0xff]  }
  0x96   : > { %1861 = vmatprep.subr.bf16.mxu0 %v3325_v1  ;;  %v3330_v4 = vld [vmem:[%s4236_s26 + $0x8] ss:$16 sps:$4 sm:$0xff]   ;;  %2033 = vmatprep.subr.bf16.mxu1 %v3327_v2  ;;  %v3331_v5 = vld [vmem:[%s4236_s26 + $0x24] ss:$16 sps:$4 sm:$0xff]   ;;  %v3333_v6 = vld [vmem:[%s4236_s26 + $0x2c] ss:$16 sps:$4 sm:$0xff]  }
  0x97   : > { %1862 = vmatpush1.bf16.msra.mxu0 %v3329_v3  ;;  %2034 = vmatpush1.bf16.msra.mxu1 %v3330_v4  ;;  %v3335_v7 = vld [vmem:[%s4236_s26 + $0x20] ss:$16 sps:$4 sm:$0xff]   ;;  %v3336_v8 = vld [vmem:[%s4236_s26 + $0x28] ss:$16 sps:$4 sm:$0xff]   ;;  %v3337_v9 = vld [vmem:[%s4236_s26 + $0x44] ss:$16 sps:$4 sm:$0xff]  }
  0x98   : > { %1863 = vmatprep.subr.bf16.mxu0 %v3331_v5  ;;  %2035 = vmatprep.subr.bf16.mxu1 %v3333_v6  ;;  %v3339_v10 = vld [vmem:[%s4236_s26 + $0x4c] ss:$16 sps:$4 sm:$0xff]   ;;  %v3341_v11 = vld [vmem:[%s4236_s26 + $0x40] ss:$16 sps:$4 sm:$0xff]   ;;  %v3342_v12 = vld [vmem:[%s4236_s26 + $0x48] ss:$16 sps:$4 sm:$0xff]  }
  0x99   : > { %v3343_v13 = vld [vmem:[%s4236_s26 + $0x64] ss:$16 sps:$4 sm:$0xff]   ;;  %v3345_v14 = vld [vmem:[%s4236_s26 + $0x6c] ss:$16 sps:$4 sm:$0xff]   ;;  %v3347_v15 = vld [vmem:[%s4236_s26 + $0x60] ss:$16 sps:$4 sm:$0xff]  }
  0x9a   : > { %v3348_v16 = vld [vmem:[%s4236_s26 + $0x68] ss:$16 sps:$4 sm:$0xff]   ;;  %v3349_v17 = vld [vmem:[%s4236_s26 + $0x84] ss:$16 sps:$4 sm:$0xff]   ;;  %v3351_v18 = vld [vmem:[%s4236_s26 + $0x8c] ss:$16 sps:$4 sm:$0xff]  }
  0x9b   : > { %1864 = vmatpush1.bf16.msra.mxu0 %v3335_v7  ;;  %2036 = vmatpush1.bf16.msra.mxu1 %v3336_v8  ;;  %v3353_v19 = vld [vmem:[%s4236_s26 + $0x80] ss:$16 sps:$4 sm:$0xff]   ;;  %v3354_v20 = vld [vmem:[%s4236_s26 + $0x88] ss:$16 sps:$4 sm:$0xff]   ;;  %v3355_v21 = vld [vmem:[%s4236_s26 + $0xa4] ss:$16 sps:$4 sm:$0xff]  }
  0x9c   : > { %1865 = vmatprep.subr.bf16.mxu0 %v3337_v9  ;;  %2037 = vmatprep.subr.bf16.mxu1 %v3339_v10  ;;  %v3357_v22 = vld [vmem:[%s4236_s26 + $0xac] ss:$16 sps:$4 sm:$0xff]   ;;  %v3359_v23 = vld [vmem:[%s4236_s26 + $0xa0] ss:$16 sps:$4 sm:$0xff]   ;;  %v3360_v24 = vld [vmem:[%s4236_s26 + $0xa8] ss:$16 sps:$4 sm:$0xff]  }
  0x9d   : > { %v3361_v25 = vld [vmem:[%s4236_s26 + $0xc4] ss:$16 sps:$4 sm:$0xff]   ;;  %v3363_v26 = vld [vmem:[%s4236_s26 + $0xcc] ss:$16 sps:$4 sm:$0xff]   ;;  %v3365_v27 = vld [vmem:[%s4236_s26 + $0xc0] ss:$16 sps:$4 sm:$0xff]  }
  0x9e   : > { %v3366_v28 = vld [vmem:[%s4236_s26 + $0xc8] ss:$16 sps:$4 sm:$0xff]   ;;  %v3367_v29 = vld [vmem:[%s4236_s26 + $0xe4] ss:$16 sps:$4 sm:$0xff]   ;;  %v3369_v30 = vld [vmem:[%s4236_s26 + $0xec] ss:$16 sps:$4 sm:$0xff]  }
  0x9f   : > { %1866 = vmatpush1.bf16.msra.mxu0 %v3341_v11  ;;  %2038 = vmatpush1.bf16.msra.mxu1 %v3342_v12  ;;  %v3371_v31 = vld [vmem:[%s4236_s26 + $0xe0] ss:$16 sps:$4 sm:$0xff]   ;;  %v3372_v32 = vld [vmem:[%s4236_s26 + $0xe8] ss:$16 sps:$4 sm:$0xff]   ;;  %v3373_v33 = vld [vmem:[%s4236_s26 + $0x104] ss:$16 sps:$4 sm:$0xff]  }
  0xa0   : > { %1867 = vmatprep.subr.bf16.mxu0 %v3343_v13  ;;  %2039 = vmatprep.subr.bf16.mxu1 %v3345_v14  ;;  %v3375_v34 = vld [vmem:[%s4236_s26 + $0x10c] ss:$16 sps:$4 sm:$0xff]   ;;  %v3377_v35 = vld [vmem:[%s4236_s26 + $0x100] ss:$16 sps:$4 sm:$0xff]   ;;  %v3378_v36 = vld [vmem:[%s4236_s26 + $0x108] ss:$16 sps:$4 sm:$0xff]  }
  0xa1   : > { %v3379_v37 = vld [vmem:[%s4236_s26 + $0x124] ss:$16 sps:$4 sm:$0xff]   ;;  %v3381_v38 = vld [vmem:[%s4236_s26 + $0x12c] ss:$16 sps:$4 sm:$0xff]   ;;  %v3383_v39 = vld [vmem:[%s4236_s26 + $0x120] ss:$16 sps:$4 sm:$0xff]  }
  0xa2   : > { %v3384_v40 = vld [vmem:[%s4236_s26 + $0x128] ss:$16 sps:$4 sm:$0xff]   ;;  %v3385_v41 = vld [vmem:[%s4236_s26 + $0x144] ss:$16 sps:$4 sm:$0xff]   ;;  %v3387_v42 = vld [vmem:[%s4236_s26 + $0x14c] ss:$16 sps:$4 sm:$0xff]  }
  0xa3   : > { %1868 = vmatpush1.bf16.msra.mxu0 %v3347_v15  ;;  %2040 = vmatpush1.bf16.msra.mxu1 %v3348_v16  ;;  %v3389_v43 = vld [vmem:[%s4236_s26 + $0x140] ss:$16 sps:$4 sm:$0xff]   ;;  %v3390_v44 = vld [vmem:[%s4236_s26 + $0x148] ss:$16 sps:$4 sm:$0xff]   ;;  %v3391_v45 = vld [vmem:[%s4236_s26 + $0x164] ss:$16 sps:$4 sm:$0xff]  }
  0xa4   : > { %1869 = vmatprep.subr.bf16.mxu0 %v3349_v17  ;;  %2041 = vmatprep.subr.bf16.mxu1 %v3351_v18  ;;  %v3393_v46 = vld [vmem:[%s4236_s26 + $0x16c] ss:$16 sps:$4 sm:$0xff]   ;;  %v277_v47 = vld [vmem:[#allocation2] sm:$0xff]  ;;  %v3396_v50 = vld [vmem:[%s4236_s26 + $0x168] ss:$16 sps:$4 sm:$0xff]   ;;  %s3129_s18 = sshll.u32 %s3951_s19, 8 }
  0xa5   : > { %v281_v48 = vld [vmem:[#allocation2 + $0x20] sm:$0xff]  ;;  %v3399_v53 = vld [vmem:[%s4236_s26 + $0x18c] ss:$16 sps:$4 sm:$0xff]   ;;  %v3402_v55 = vld [vmem:[%s4236_s26 + $0x188] ss:$16 sps:$4 sm:$0xff]   ;;  %s2683_s29 = sshll.u32 %s4247_s27, 4  ;;  %s4621_s29 = int_to_ptr.vmem [resolvable:$true] %s2683_s29 }
  0xa6   : > { %v3395_v49 = vld [vmem:[%s4236_s26 + $0x160] ss:$16 sps:$4 sm:$0xff]   ;;  %v2827_v51 = vcombine.high %v277_v47, %v281_v48  ;;  %v3397_v52 = vld [vmem:[%s4236_s26 + $0x184] ss:$16 sps:$4 sm:$0xff]   ;;  %v3405_v57 = vld [vmem:[%s4236_s26 + $0x1ac] ss:$16 sps:$4 sm:$0xff]   ;;  %v2826_v6 = vcombine.low %v277_v47, %v281_v48 }
  0xa7   : > { %1870 = vmatpush1.bf16.msra.mxu0 %v3353_v19  ;;  %2042 = vmatpush1.bf16.msra.mxu1 %v3354_v20  ;;  %v3401_v54 = vld [vmem:[%s4236_s26 + $0x180] ss:$16 sps:$4 sm:$0xff]   ;;  %v3403_v56 = vld [vmem:[%s4236_s26 + $0x1a4] ss:$16 sps:$4 sm:$0xff]   ;;  %v3408_v59 = vld [vmem:[%s4236_s26 + $0x1a8] ss:$16 sps:$4 sm:$0xff]  }
  0xa8   : > { %1871 = vmatprep.subr.bf16.mxu0 %v3355_v21  ;;  %2043 = vmatprep.subr.bf16.mxu1 %v3357_v22  ;;  %v3407_v58 = vld [vmem:[%s4236_s26 + $0x1a0] ss:$16 sps:$4 sm:$0xff]   ;;  %v3409_v60 = vld [vmem:[%s4236_s26 + $0x1c4] ss:$16 sps:$4 sm:$0xff]   ;;  %v3411_v61 = vld [vmem:[%s4236_s26 + $0x1cc] ss:$16 sps:$4 sm:$0xff]  }
  0xa9   : > { %1893 = vmatprep.mubr.bf16.mxu0 %v2827_v51  ;;  %2065 = vmatprep.mubr.bf16.mxu1 %v2827_v51  ;;  %v3413_v62 = vld [vmem:[%s4236_s26 + $0x1c0] ss:$16 sps:$4 sm:$0xff]   ;;  %v3414_v63 = vld [vmem:[%s4236_s26 + $0x1c8] ss:$16 sps:$4 sm:$0xff]   ;;  %v3415_v0 = vld [vmem:[%s4236_s26 + $0x1e4] ss:$16 sps:$4 sm:$0xff]  }
  0xaa   : > { %v3417_v1 = vld [vmem:[%s4236_s26 + $0x1ec] ss:$16 sps:$4 sm:$0xff]   ;;  %v3419_v2 = vld [vmem:[%s4236_s26 + $0x1e0] ss:$16 sps:$4 sm:$0xff]   ;;  %v3420_v3 = vld [vmem:[%s4236_s26 + $0x1e8] ss:$16 sps:$4 sm:$0xff]  }
  0xab   : > { %1872 = vmatpush1.bf16.msra.mxu0 %v3359_v23  ;;  %2044 = vmatpush1.bf16.msra.mxu1 %v3360_v24  ;;  %v3423_v4 = vld [vmem:[%s4236_s26 + $0x204] ss:$16 sps:$4 sm:$0xff]   ;;  %v3426_v5 = vld [vmem:[%s4236_s26 + $0x20c] ss:$16 sps:$4 sm:$0xff]   ;;  %v3421_v7 = vld [vmem:[%s4236_s26 + $0x200] ss:$16 sps:$4 sm:$0xff]  }
  0xac   : > { %1873 = vmatprep.subr.bf16.mxu0 %v3361_v25  ;;  %2045 = vmatprep.subr.bf16.mxu1 %v3363_v26  ;;  %v3424_v8 = vld [vmem:[%s4236_s26 + $0x208] ss:$16 sps:$4 sm:$0xff]   ;;  %v3429_v9 = vld [vmem:[%s4236_s26 + $0x224] ss:$16 sps:$4 sm:$0xff]   ;;  %v3432_v10 = vld [vmem:[%s4236_s26 + $0x22c] ss:$16 sps:$4 sm:$0xff]  }
  0xad   : > { %v3427_v11 = vld [vmem:[%s4236_s26 + $0x220] ss:$16 sps:$4 sm:$0xff]   ;;  %v3430_v12 = vld [vmem:[%s4236_s26 + $0x228] ss:$16 sps:$4 sm:$0xff]   ;;  %v3435_v13 = vld [vmem:[%s4236_s26 + $0x244] ss:$16 sps:$4 sm:$0xff]  }
  0xae   : > { %v3438_v14 = vld [vmem:[%s4236_s26 + $0x24c] ss:$16 sps:$4 sm:$0xff]   ;;  %v3433_v15 = vld [vmem:[%s4236_s26 + $0x240] ss:$16 sps:$4 sm:$0xff]   ;;  %v3436_v16 = vld [vmem:[%s4236_s26 + $0x248] ss:$16 sps:$4 sm:$0xff]  }
  0xaf   : > { %1874 = vmatpush1.bf16.msra.mxu0 %v3365_v27  ;;  %2046 = vmatpush1.bf16.msra.mxu1 %v3366_v28  ;;  %v3441_v17 = vld [vmem:[%s4236_s26 + $0x264] ss:$16 sps:$4 sm:$0xff]   ;;  %v3444_v18 = vld [vmem:[%s4236_s26 + $0x26c] ss:$16 sps:$4 sm:$0xff]   ;;  %v3439_v19 = vld [vmem:[%s4236_s26 + $0x260] ss:$16 sps:$4 sm:$0xff]  }
  0xb0   : > { %1875 = vmatprep.subr.bf16.mxu0 %v3367_v29  ;;  %2047 = vmatprep.subr.bf16.mxu1 %v3369_v30  ;;  %v3442_v20 = vld [vmem:[%s4236_s26 + $0x268] ss:$16 sps:$4 sm:$0xff]   ;;  %v3447_v21 = vld [vmem:[%s4236_s26 + $0x284] ss:$16 sps:$4 sm:$0xff]   ;;  %v3450_v22 = vld [vmem:[%s4236_s26 + $0x28c] ss:$16 sps:$4 sm:$0xff]  }
  0xb1   : > { %v3445_v23 = vld [vmem:[%s4236_s26 + $0x280] ss:$16 sps:$4 sm:$0xff]   ;;  %v3448_v24 = vld [vmem:[%s4236_s26 + $0x288] ss:$16 sps:$4 sm:$0xff]   ;;  %v3453_v25 = vld [vmem:[%s4236_s26 + $0x2a4] ss:$16 sps:$4 sm:$0xff]  }
  0xb2   : > { %v3456_v26 = vld [vmem:[%s4236_s26 + $0x2ac] ss:$16 sps:$4 sm:$0xff]   ;;  %v3451_v27 = vld [vmem:[%s4236_s26 + $0x2a0] ss:$16 sps:$4 sm:$0xff]   ;;  %v3454_v28 = vld [vmem:[%s4236_s26 + $0x2a8] ss:$16 sps:$4 sm:$0xff]  }
  0xb3   : > { %1876 = vmatpush1.bf16.msra.mxu0 %v3371_v31  ;;  %2048 = vmatpush1.bf16.msra.mxu1 %v3372_v32  ;;  %v3459_v29 = vld [vmem:[%s4236_s26 + $0x2c4] ss:$16 sps:$4 sm:$0xff]   ;;  %v3462_v30 = vld [vmem:[%s4236_s26 + $0x2cc] ss:$16 sps:$4 sm:$0xff]   ;;  %v3478_v47 = vld [vmem:[%s4236_s26 + $0x328] ss:$16 sps:$4 sm:$0xff]  }
  0xb4   : > { %1877 = vmatprep.subr.bf16.mxu0 %v3373_v33  ;;  %2049 = vmatprep.subr.bf16.mxu1 %v3375_v34  ;;  %v4342_v31 = vld [vmem:[#allocation2 + $0x8] sm:$0xff]  ;;  %v3457_v33 = vld [vmem:[%s4236_s26 + $0x2c0] ss:$16 sps:$4 sm:$0xff]   ;;  %v3483_v48 = vld [vmem:[%s4236_s26 + $0x344] ss:$16 sps:$4 sm:$0xff]   ;;  %s4729_s8 = sld [smem:[#allocation19_spill]] }
  0xb5   : > { %v4344_v32 = vld [vmem:[#allocation2 + $0x28] sm:$0xff]  ;;  %s4627_s21 = scalar_lea.sflag [#allocation4], %s262_s6  ;;  %s3837_s19 = scalar_lea.vmem %s4621_s29, 256 }
  0xb6   : > { %v3460_v34 = vld [vmem:[%s4236_s26 + $0x2c8] ss:$16 sps:$4 sm:$0xff]   ;;  %p3838_p13 = scmp.ne.s32.totalorder %s4621_s29, %s3837_s19  ;;  %p4730_p3 = scmp.ne.s32.totalorder %s4718_s5, 0 }
  0xb7   : > { %1878 = vmatpush1.bf16.msra.mxu0 %v3377_v35  ;;  %2050 = vmatpush1.bf16.msra.mxu1 %v3378_v36  ;;  %v2829_v35 = vcombine.high %v4342_v31, %v4344_v32  ;;  %v3465_v36 = vld [vmem:[%s4236_s26 + $0x2e4] ss:$16 sps:$4 sm:$0xff]   ;;  %v3484_v51 = vld [vmem:[%s4236_s26 + $0x348] ss:$16 sps:$4 sm:$0xff]   ;;  %s3975_s17 = smov [#allocation8]  }
  0xb8   : > { %1879 = vmatprep.subr.bf16.mxu0 %v3379_v37  ;;  %2051 = vmatprep.subr.bf16.mxu1 %v3381_v38  ;;  %v3468_v37 = vld [vmem:[%s4236_s26 + $0x2ec] ss:$16 sps:$4 sm:$0xff]   ;;  %v3463_v38 = vld [vmem:[%s4236_s26 + $0x2e0] ss:$16 sps:$4 sm:$0xff]   ;;  %p3839_p0 = pnand %p3838_p13, %p4730_p3  ;;  %s3841_s23 = sshll.u32 %s3975_s17, 4  ;;  %s3842_s23 = int_to_ptr.vmem [resolvable:$false] %s3841_s23 }
  0xb9   : > { %s3843_s24 = scalar_lea.vmem %s3842_s23, 512  ;;  %p3844_p10 = scmp.lt.s32.totalorder %s4621_s29, %s3842_s23 }
  0xba   : > { %s4619_s25 = scalar_lea.hbm %s4729_s8, %s3129_s18  ;;  %p3840_p6 = pneg %p3839_p0 }
  0xbb   : > { %1880 = vmatpush1.bf16.msra.mxu0 %v3383_v39  ;;  %2052 = vmatpush1.bf16.msra.mxu1 %v3384_v40  ;;  %v3466_v39 = vld [vmem:[%s4236_s26 + $0x2e8] ss:$16 sps:$4 sm:$0xff]   ;;  %v3471_v40 = vld [vmem:[%s4236_s26 + $0x304] ss:$16 sps:$4 sm:$0xff]   ;;  %p3845_p5 = scmp.lt.s32.totalorder %s3843_s24, %s3837_s19 }
  0xbc   : > { %1881 = vmatprep.subr.bf16.mxu0 %v3385_v41  ;;  %2053 = vmatprep.subr.bf16.mxu1 %v3387_v42  ;;  %v3474_v41 = vld [vmem:[%s4236_s26 + $0x30c] ss:$16 sps:$4 sm:$0xff]   ;;  %v3469_v42 = vld [vmem:[%s4236_s26 + $0x300] ss:$16 sps:$4 sm:$0xff]  }
  0xbd   : > { %p3846_p4 = por %p3845_p5, %p3844_p10 }
  0xbf   : > { %1882 = vmatpush1.bf16.msra.mxu0 %v3389_v43  ;;  %2054 = vmatpush1.bf16.msra.mxu1 %v3390_v44  ;;  %v3472_v43 = vld [vmem:[%s4236_s26 + $0x308] ss:$16 sps:$4 sm:$0xff]   ;;  %v3477_v44 = vld [vmem:[%s4236_s26 + $0x324] ss:$16 sps:$4 sm:$0xff]   ;;  %p3847_p8 = pnand %p3846_p4, %p3840_p6 }
  0xc0   : > { %1883 = vmatprep.subr.bf16.mxu0 %v3391_v45  ;;  %2055 = vmatprep.subr.bf16.mxu1 %v3393_v46  ;;  %v3480_v45 = vld [vmem:[%s4236_s26 + $0x32c] ss:$16 sps:$4 sm:$0xff]   ;;  %v3475_v46 = vld [vmem:[%s4236_s26 + $0x320] ss:$16 sps:$4 sm:$0xff]  }
  0xc3   : > { %1884 = vmatpush1.bf16.msra.mxu0 %v3395_v49  ;;  %2056 = vmatpush1.bf16.msra.mxu1 %v3396_v50  ;;  %v3486_v49 = vld [vmem:[%s4236_s26 + $0x34c] ss:$16 sps:$4 sm:$0xff]   ;;  %v3481_v50 = vld [vmem:[%s4236_s26 + $0x340] ss:$16 sps:$4 sm:$0xff]  }
  0xc4   : > { %1885 = vmatprep.subr.bf16.mxu0 %v3397_v52  ;;  %2057 = vmatprep.subr.bf16.mxu1 %v3399_v53  ;;  %v3489_v52 = vld [vmem:[%s4236_s26 + $0x364] ss:$16 sps:$4 sm:$0xff]   ;;  %v3492_v53 = vld [vmem:[%s4236_s26 + $0x36c] ss:$16 sps:$4 sm:$0xff]  }
  0xc7   : > { %1886 = vmatpush1.bf16.msra.mxu0 %v3401_v54  ;;  %2058 = vmatpush1.bf16.msra.mxu1 %v3402_v55  ;;  %v3487_v54 = vld [vmem:[%s4236_s26 + $0x360] ss:$16 sps:$4 sm:$0xff]   ;;  %v3490_v55 = vld [vmem:[%s4236_s26 + $0x368] ss:$16 sps:$4 sm:$0xff]  }
  0xc8   : > { %1887 = vmatprep.subr.bf16.mxu0 %v3403_v56  ;;  %2059 = vmatprep.subr.bf16.mxu1 %v3405_v57  ;;  %v3495_v56 = vld [vmem:[%s4236_s26 + $0x384] ss:$16 sps:$4 sm:$0xff]   ;;  %v3498_v57 = vld [vmem:[%s4236_s26 + $0x38c] ss:$16 sps:$4 sm:$0xff]  }
  0xcb   : > { %1888 = vmatpush1.bf16.msra.mxu0 %v3407_v58  ;;  %2060 = vmatpush1.bf16.msra.mxu1 %v3408_v59  ;;  %v3493_v58 = vld [vmem:[%s4236_s26 + $0x380] ss:$16 sps:$4 sm:$0xff]   ;;  %v3496_v59 = vld [vmem:[%s4236_s26 + $0x388] ss:$16 sps:$4 sm:$0xff]  }
  0xcc   : > { %1889 = vmatprep.subr.bf16.mxu0 %v3409_v60  ;;  %2061 = vmatprep.subr.bf16.mxu1 %v3411_v61  ;;  %v3501_v60 = vld [vmem:[%s4236_s26 + $0x3a4] ss:$16 sps:$4 sm:$0xff]   ;;  %v3504_v61 = vld [vmem:[%s4236_s26 + $0x3ac] ss:$16 sps:$4 sm:$0xff]  }
  0xcf   : > { %1890 = vmatpush1.bf16.msra.mxu0 %v3413_v62  ;;  %2062 = vmatpush1.bf16.msra.mxu1 %v3414_v63  ;;  %v3499_v62 = vld [vmem:[%s4236_s26 + $0x3a0] ss:$16 sps:$4 sm:$0xff]   ;;  %v3502_v63 = vld [vmem:[%s4236_s26 + $0x3a8] ss:$16 sps:$4 sm:$0xff]  }
  0xd0   : > { %1891 = vmatprep.subr.bf16.mxu0 %v3415_v0  ;;  %2063 = vmatprep.subr.bf16.mxu1 %v3417_v1  ;;  %v3507_v0 = vld [vmem:[%s4236_s26 + $0x3c4] ss:$16 sps:$4 sm:$0xff]   ;;  %v3510_v1 = vld [vmem:[%s4236_s26 + $0x3cc] ss:$16 sps:$4 sm:$0xff]  }
  0xd3   : > { %1892 = vmatpush1.bf16.msra.mxu0 %v3419_v2  ;;  %2064 = vmatpush1.bf16.msra.mxu1 %v3420_v3  ;;  %v3505_v2 = vld [vmem:[%s4236_s26 + $0x3c0] ss:$16 sps:$4 sm:$0xff]   ;;  %v3508_v3 = vld [vmem:[%s4236_s26 + $0x3c8] ss:$16 sps:$4 sm:$0xff]  }
  0xd4   : > { %1904 = vmatprep.subr.bf16.mxu0 %v3423_v4  ;;  %2076 = vmatprep.subr.bf16.mxu1 %v3426_v5  ;;  %v3513_v4 = vld [vmem:[%s4236_s26 + $0x3e4] ss:$16 sps:$4 sm:$0xff]   ;;  %v3516_v5 = vld [vmem:[%s4236_s26 + $0x3ec] ss:$16 sps:$4 sm:$0xff]  }
  0xd6   : > { %1894 = vmatmul.mubr.bf16.vlgmr.msra.gmra.mrb[0].mxu0 %v2826_v6  ;;  %2066 = vmatmul.mubr.bf16.vlgmr.msra.gmra.mrb[0].mxu1 %v2826_v6  ;;  %v3511_v6 = vld [vmem:[%s4236_s26 + $0x3e0] ss:$16 sps:$4 sm:$0xff]  }
  0xd7   : > { %1905 = vmatpush1.bf16.msra.mxu0 %v3421_v7  ;;  %2077 = vmatpush1.bf16.msra.mxu1 %v3424_v8  ;;  %v3514_v7 = vld [vmem:[%s4236_s26 + $0x3e8] ss:$16 sps:$4 sm:$0xff]   ;;  %v3519_v8 = vld [vmem:[%s4236_s26 + $0x404] ss:$16 sps:$4 sm:$0xff]  }
  0xd8   : > { %1906 = vmatprep.subr.bf16.mxu0 %v3429_v9  ;;  %2078 = vmatprep.subr.bf16.mxu1 %v3432_v10  ;;  %v3522_v9 = vld [vmem:[%s4236_s26 + $0x40c] ss:$16 sps:$4 sm:$0xff]   ;;  %v2828_v10 = vcombine.low %v4342_v31, %v4344_v32  ;;  %v3544_v31 = vld [vmem:[%s4236_s26 + $0x488] ss:$16 sps:$4 sm:$0xff]   ;;  %v3549_v32 = vld [vmem:[%s4236_s26 + $0x4a4] ss:$16 sps:$4 sm:$0xff]  }
  0xd9   : > { %1936 = vmatprep.mubr.bf16.mxu0 %v2829_v35  ;;  %2108 = vmatprep.mubr.bf16.mxu1 %v2829_v35  ;;  %v3550_v35 = vld [vmem:[%s4236_s26 + $0x4a8] ss:$16 sps:$4 sm:$0xff]  }
  0xdb   : > { %1907 = vmatpush1.bf16.msra.mxu0 %v3427_v11  ;;  %2079 = vmatpush1.bf16.msra.mxu1 %v3430_v12  ;;  %v3517_v11 = vld [vmem:[%s4236_s26 + $0x400] ss:$16 sps:$4 sm:$0xff]   ;;  %v3520_v12 = vld [vmem:[%s4236_s26 + $0x408] ss:$16 sps:$4 sm:$0xff]  }
  0xdc   : > { %1908 = vmatprep.subr.bf16.mxu0 %v3435_v13  ;;  %2080 = vmatprep.subr.bf16.mxu1 %v3438_v14  ;;  %v3525_v13 = vld [vmem:[%s4236_s26 + $0x424] ss:$16 sps:$4 sm:$0xff]   ;;  %v3528_v14 = vld [vmem:[%s4236_s26 + $0x42c] ss:$16 sps:$4 sm:$0xff]  }
  0xdf   : > { %1909 = vmatpush1.bf16.msra.mxu0 %v3433_v15  ;;  %2081 = vmatpush1.bf16.msra.mxu1 %v3436_v16  ;;  %v4394_v15 = vld [vmem:[#allocation2 + $0x10] sm:$0xff] }
  0xe0   : > { %1910 = vmatprep.subr.bf16.mxu0 %v3441_v17  ;;  %2082 = vmatprep.subr.bf16.mxu1 %v3444_v18  ;;  %v4396_v16 = vld [vmem:[#allocation2 + $0x30] sm:$0xff] }
  0xe1   : > { %v2831_v17 = vcombine.high %v4394_v15, %v4396_v16  ;;  %v3523_v18 = vld [vmem:[%s4236_s26 + $0x420] ss:$16 sps:$4 sm:$0xff]  }
  0xe3   : > { %1911 = vmatpush1.bf16.msra.mxu0 %v3439_v19  ;;  %2083 = vmatpush1.bf16.msra.mxu1 %v3442_v20  ;;  %v3526_v19 = vld [vmem:[%s4236_s26 + $0x428] ss:$16 sps:$4 sm:$0xff]   ;;  %v3531_v20 = vld [vmem:[%s4236_s26 + $0x444] ss:$16 sps:$4 sm:$0xff]  }
  0xe4   : > { %1912 = vmatprep.subr.bf16.mxu0 %v3447_v21  ;;  %2084 = vmatprep.subr.bf16.mxu1 %v3450_v22  ;;  %v3534_v21 = vld [vmem:[%s4236_s26 + $0x44c] ss:$16 sps:$4 sm:$0xff]   ;;  %v3529_v22 = vld [vmem:[%s4236_s26 + $0x440] ss:$16 sps:$4 sm:$0xff]  }
  0xe7   : > { %1913 = vmatpush1.bf16.msra.mxu0 %v3445_v23  ;;  %2085 = vmatpush1.bf16.msra.mxu1 %v3448_v24  ;;  %v3532_v23 = vld [vmem:[%s4236_s26 + $0x448] ss:$16 sps:$4 sm:$0xff]   ;;  %v3537_v24 = vld [vmem:[%s4236_s26 + $0x464] ss:$16 sps:$4 sm:$0xff]  }
  0xe8   : > { %1914 = vmatprep.subr.bf16.mxu0 %v3453_v25  ;;  %2086 = vmatprep.subr.bf16.mxu1 %v3456_v26  ;;  %v3540_v25 = vld [vmem:[%s4236_s26 + $0x46c] ss:$16 sps:$4 sm:$0xff]   ;;  %v3535_v26 = vld [vmem:[%s4236_s26 + $0x460] ss:$16 sps:$4 sm:$0xff]  }
  0xeb   : > { %1915 = vmatpush1.bf16.msra.mxu0 %v3451_v27  ;;  %2087 = vmatpush1.bf16.msra.mxu1 %v3454_v28  ;;  %v3538_v27 = vld [vmem:[%s4236_s26 + $0x468] ss:$16 sps:$4 sm:$0xff]   ;;  %v3543_v28 = vld [vmem:[%s4236_s26 + $0x484] ss:$16 sps:$4 sm:$0xff]  }
  0xec   : > { %1916 = vmatprep.subr.bf16.mxu0 %v3459_v29  ;;  %2088 = vmatprep.subr.bf16.mxu1 %v3462_v30  ;;  %v3546_v29 = vld [vmem:[%s4236_s26 + $0x48c] ss:$16 sps:$4 sm:$0xff]   ;;  %v3541_v30 = vld [vmem:[%s4236_s26 + $0x480] ss:$16 sps:$4 sm:$0xff]  }
  0xef   : > { %1917 = vmatpush1.bf16.msra.mxu0 %v3457_v33  ;;  %2089 = vmatpush1.bf16.msra.mxu1 %v3460_v34  ;;  %v3552_v33 = vld [vmem:[%s4236_s26 + $0x4ac] ss:$16 sps:$4 sm:$0xff]   ;;  %v3547_v34 = vld [vmem:[%s4236_s26 + $0x4a0] ss:$16 sps:$4 sm:$0xff]  }
  0xf0   : > { %1918 = vmatprep.subr.bf16.mxu0 %v3465_v36  ;;  %2090 = vmatprep.subr.bf16.mxu1 %v3468_v37  ;;  %v3555_v36 = vld [vmem:[%s4236_s26 + $0x4c4] ss:$16 sps:$4 sm:$0xff]   ;;  %v3558_v37 = vld [vmem:[%s4236_s26 + $0x4cc] ss:$16 sps:$4 sm:$0xff]  }
  0xf3   : > { %1919 = vmatpush1.bf16.msra.mxu0 %v3463_v38  ;;  %2091 = vmatpush1.bf16.msra.mxu1 %v3466_v39  ;;  %v3553_v38 = vld [vmem:[%s4236_s26 + $0x4c0] ss:$16 sps:$4 sm:$0xff]   ;;  %v3556_v39 = vld [vmem:[%s4236_s26 + $0x4c8] ss:$16 sps:$4 sm:$0xff]  }
  0xf4   : > { %1920 = vmatprep.subr.bf16.mxu0 %v3471_v40  ;;  %2092 = vmatprep.subr.bf16.mxu1 %v3474_v41  ;;  %v3561_v40 = vld [vmem:[%s4236_s26 + $0x4e4] ss:$16 sps:$4 sm:$0xff]   ;;  %v3564_v41 = vld [vmem:[%s4236_s26 + $0x4ec] ss:$16 sps:$4 sm:$0xff]  }
  0xf7   : > { %1921 = vmatpush1.bf16.msra.mxu0 %v3469_v42  ;;  %2093 = vmatpush1.bf16.msra.mxu1 %v3472_v43  ;;  %v3559_v42 = vld [vmem:[%s4236_s26 + $0x4e0] ss:$16 sps:$4 sm:$0xff]   ;;  %v3562_v43 = vld [vmem:[%s4236_s26 + $0x4e8] ss:$16 sps:$4 sm:$0xff]  }
  0xf8   : > { %1922 = vmatprep.subr.bf16.mxu0 %v3477_v44  ;;  %2094 = vmatprep.subr.bf16.mxu1 %v3480_v45  ;;  %v3567_v44 = vld [vmem:[%s4236_s26 + $0x504] ss:$16 sps:$4 sm:$0xff]   ;;  %v3570_v45 = vld [vmem:[%s4236_s26 + $0x50c] ss:$16 sps:$4 sm:$0xff]  }
  0xfb   : > { %1923 = vmatpush1.bf16.msra.mxu0 %v3475_v46  ;;  %2095 = vmatpush1.bf16.msra.mxu1 %v3478_v47  ;;  %v3565_v46 = vld [vmem:[%s4236_s26 + $0x500] ss:$16 sps:$4 sm:$0xff]   ;;  %v3568_v47 = vld [vmem:[%s4236_s26 + $0x508] ss:$16 sps:$4 sm:$0xff]  }
  0xfc   : > { %1924 = vmatprep.subr.bf16.mxu0 %v3483_v48  ;;  %2096 = vmatprep.subr.bf16.mxu1 %v3486_v49  ;;  %v3573_v48 = vld [vmem:[%s4236_s26 + $0x524] ss:$16 sps:$4 sm:$0xff]   ;;  %v3576_v49 = vld [vmem:[%s4236_s26 + $0x52c] ss:$16 sps:$4 sm:$0xff]  }
  0xff   : > { %1925 = vmatpush1.bf16.msra.mxu0 %v3481_v50  ;;  %2097 = vmatpush1.bf16.msra.mxu1 %v3484_v51  ;;  %v3571_v50 = vld [vmem:[%s4236_s26 + $0x520] ss:$16 sps:$4 sm:$0xff]   ;;  %v3574_v51 = vld [vmem:[%s4236_s26 + $0x528] ss:$16 sps:$4 sm:$0xff]  }
 0x100   : > { %1926 = vmatprep.subr.bf16.mxu0 %v3489_v52  ;;  %2098 = vmatprep.subr.bf16.mxu1 %v3492_v53  ;;  %v3579_v52 = vld [vmem:[%s4236_s26 + $0x544] ss:$16 sps:$4 sm:$0xff]   ;;  %v3582_v53 = vld [vmem:[%s4236_s26 + $0x54c] ss:$16 sps:$4 sm:$0xff]  }
 0x103   : > { %1927 = vmatpush1.bf16.msra.mxu0 %v3487_v54  ;;  %2099 = vmatpush1.bf16.msra.mxu1 %v3490_v55  ;;  %v3577_v54 = vld [vmem:[%s4236_s26 + $0x540] ss:$16 sps:$4 sm:$0xff]   ;;  %v3580_v55 = vld [vmem:[%s4236_s26 + $0x548] ss:$16 sps:$4 sm:$0xff]  }
 0x104   : > { %1928 = vmatprep.subr.bf16.mxu0 %v3495_v56  ;;  %2100 = vmatprep.subr.bf16.mxu1 %v3498_v57  ;;  %v3585_v56 = vld [vmem:[%s4236_s26 + $0x564] ss:$16 sps:$4 sm:$0xff]   ;;  %v3588_v57 = vld [vmem:[%s4236_s26 + $0x56c] ss:$16 sps:$4 sm:$0xff]  }
 0x107   : > { %1929 = vmatpush1.bf16.msra.mxu0 %v3493_v58  ;;  %2101 = vmatpush1.bf16.msra.mxu1 %v3496_v59  ;;  %v3583_v58 = vld [vmem:[%s4236_s26 + $0x560] ss:$16 sps:$4 sm:$0xff]   ;;  %v3586_v59 = vld [vmem:[%s4236_s26 + $0x568] ss:$16 sps:$4 sm:$0xff]  }
 0x108   : > { %1930 = vmatprep.subr.bf16.mxu0 %v3501_v60  ;;  %2102 = vmatprep.subr.bf16.mxu1 %v3504_v61  ;;  %v3591_v60 = vld [vmem:[%s4236_s26 + $0x584] ss:$16 sps:$4 sm:$0xff]   ;;  %v3594_v61 = vld [vmem:[%s4236_s26 + $0x58c] ss:$16 sps:$4 sm:$0xff]  }
 0x10b   : > { %1931 = vmatpush1.bf16.msra.mxu0 %v3499_v62  ;;  %2103 = vmatpush1.bf16.msra.mxu1 %v3502_v63  ;;  %v3589_v62 = vld [vmem:[%s4236_s26 + $0x580] ss:$16 sps:$4 sm:$0xff]   ;;  %v3592_v63 = vld [vmem:[%s4236_s26 + $0x588] ss:$16 sps:$4 sm:$0xff]  }
 0x10c   : > { %1932 = vmatprep.subr.bf16.mxu0 %v3507_v0  ;;  %2104 = vmatprep.subr.bf16.mxu1 %v3510_v1  ;;  %v3597_v0 = vld [vmem:[%s4236_s26 + $0x5a4] ss:$16 sps:$4 sm:$0xff]   ;;  %v3600_v1 = vld [vmem:[%s4236_s26 + $0x5ac] ss:$16 sps:$4 sm:$0xff]  }
 0x10f   : > { %1933 = vmatpush1.bf16.msra.mxu0 %v3505_v2  ;;  %2105 = vmatpush1.bf16.msra.mxu1 %v3508_v3  ;;  %v3595_v2 = vld [vmem:[%s4236_s26 + $0x5a0] ss:$16 sps:$4 sm:$0xff]   ;;  %v3598_v3 = vld [vmem:[%s4236_s26 + $0x5a8] ss:$16 sps:$4 sm:$0xff]  }
 0x110   : > { %1934 = vmatprep.subr.bf16.mxu0 %v3513_v4  ;;  %2106 = vmatprep.subr.bf16.mxu1 %v3516_v5  ;;  %v3603_v4 = vld [vmem:[%s4236_s26 + $0x5c4] ss:$16 sps:$4 sm:$0xff]   ;;  %v3606_v5 = vld [vmem:[%s4236_s26 + $0x5cc] ss:$16 sps:$4 sm:$0xff]  }
 0x113   : > { %1935 = vmatpush1.bf16.msra.mxu0 %v3511_v6  ;;  %2107 = vmatpush1.bf16.msra.mxu1 %v3514_v7  ;;  %v3601_v6 = vld [vmem:[%s4236_s26 + $0x5c0] ss:$16 sps:$4 sm:$0xff]   ;;  %v3604_v7 = vld [vmem:[%s4236_s26 + $0x5c8] ss:$16 sps:$4 sm:$0xff]  }
 0x114   : > { %1947 = vmatprep.subr.bf16.mxu0 %v3519_v8  ;;  %2119 = vmatprep.subr.bf16.mxu1 %v3522_v9  ;;  %v3609_v8 = vld [vmem:[%s4236_s26 + $0x5e4] ss:$16 sps:$4 sm:$0xff]   ;;  %v3612_v9 = vld [vmem:[%s4236_s26 + $0x5ec] ss:$16 sps:$4 sm:$0xff]  }
 0x116   : > { %1937 = vmatmul.mubr.bf16.vlgmr.msra.gmra.mrb[0].mxu0 %v2828_v10  ;;  %2109 = vmatmul.mubr.bf16.vlgmr.msra.gmra.mrb[0].mxu1 %v2828_v10  ;;  %v3607_v10 = vld [vmem:[%s4236_s26 + $0x5e0] ss:$16 sps:$4 sm:$0xff]  }
 0x117   : > { %1948 = vmatpush1.bf16.msra.mxu0 %v3517_v11  ;;  %2120 = vmatpush1.bf16.msra.mxu1 %v3520_v12  ;;  %v3610_v11 = vld [vmem:[%s4236_s26 + $0x5e8] ss:$16 sps:$4 sm:$0xff]   ;;  %v3615_v12 = vld [vmem:[%s4236_s26 + $0x604] ss:$16 sps:$4 sm:$0xff]  }
 0x118   : > { %1949 = vmatprep.subr.bf16.mxu0 %v3525_v13  ;;  %2121 = vmatprep.subr.bf16.mxu1 %v3528_v14  ;;  %v3618_v13 = vld [vmem:[%s4236_s26 + $0x60c] ss:$16 sps:$4 sm:$0xff]  }
 0x119   : > { %1979 = vmatprep.mubr.bf16.mxu0 %v2831_v17  ;;  %2151 = vmatprep.mubr.bf16.mxu1 %v2831_v17  ;;  %v4460_v14 = vld [vmem:[#allocation2 + $0x18] sm:$0xff] }
 0x11a   : > { %v4462_v17 = vld [vmem:[#allocation2 + $0x38] sm:$0xff] }
 0x11b   : > { %1950 = vmatpush1.bf16.msra.mxu0 %v3523_v18  ;;  %2122 = vmatpush1.bf16.msra.mxu1 %v3526_v19  ;;  %v3613_v18 = vld [vmem:[%s4236_s26 + $0x600] ss:$16 sps:$4 sm:$0xff]   ;;  %v3616_v19 = vld [vmem:[%s4236_s26 + $0x608] ss:$16 sps:$4 sm:$0xff]  }
 0x11c   : > { %1951 = vmatprep.subr.bf16.mxu0 %v3531_v20  ;;  %2123 = vmatprep.subr.bf16.mxu1 %v3534_v21  ;;  %v2830_v20 = vcombine.low %v4394_v15, %v4396_v16  ;;  %v3621_v21 = vld [vmem:[%s4236_s26 + $0x624] ss:$16 sps:$4 sm:$0xff]   ;;  %v3619_v15 = vld [vmem:[%s4236_s26 + $0x620] ss:$16 sps:$4 sm:$0xff]   ;;  %v3622_v16 = vld [vmem:[%s4236_s26 + $0x628] ss:$16 sps:$4 sm:$0xff]  }
 0x11f   : > { %1952 = vmatpush1.bf16.msra.mxu0 %v3529_v22  ;;  %2124 = vmatpush1.bf16.msra.mxu1 %v3532_v23  ;;  %v3624_v22 = vld [vmem:[%s4236_s26 + $0x62c] ss:$16 sps:$4 sm:$0xff]   ;;  %v2833_v23 = vcombine.high %v4460_v14, %v4462_v17 }
 0x120   : > { %1953 = vmatprep.subr.bf16.mxu0 %v3537_v24  ;;  %2125 = vmatprep.subr.bf16.mxu1 %v3540_v25  ;;  %v3627_v24 = vld [vmem:[%s4236_s26 + $0x644] ss:$16 sps:$4 sm:$0xff]   ;;  %v3630_v25 = vld [vmem:[%s4236_s26 + $0x64c] ss:$16 sps:$4 sm:$0xff]  }
 0x123   : > { %1954 = vmatpush1.bf16.msra.mxu0 %v3535_v26  ;;  %2126 = vmatpush1.bf16.msra.mxu1 %v3538_v27  ;;  %v3625_v26 = vld [vmem:[%s4236_s26 + $0x640] ss:$16 sps:$4 sm:$0xff]   ;;  %v3628_v27 = vld [vmem:[%s4236_s26 + $0x648] ss:$16 sps:$4 sm:$0xff]  }
 0x124   : > { %1955 = vmatprep.subr.bf16.mxu0 %v3543_v28  ;;  %2127 = vmatprep.subr.bf16.mxu1 %v3546_v29  ;;  %v3633_v28 = vld [vmem:[%s4236_s26 + $0x664] ss:$16 sps:$4 sm:$0xff]   ;;  %v3636_v29 = vld [vmem:[%s4236_s26 + $0x66c] ss:$16 sps:$4 sm:$0xff]  }
 0x127   : > { %1956 = vmatpush1.bf16.msra.mxu0 %v3541_v30  ;;  %2128 = vmatpush1.bf16.msra.mxu1 %v3544_v31  ;;  %v3631_v30 = vld [vmem:[%s4236_s26 + $0x660] ss:$16 sps:$4 sm:$0xff]   ;;  %v3634_v31 = vld [vmem:[%s4236_s26 + $0x668] ss:$16 sps:$4 sm:$0xff]  }
 0x128   : > { %1957 = vmatprep.subr.bf16.mxu0 %v3549_v32  ;;  %2129 = vmatprep.subr.bf16.mxu1 %v3552_v33  ;;  %v3639_v32 = vld [vmem:[%s4236_s26 + $0x684] ss:$16 sps:$4 sm:$0xff]   ;;  %v3642_v33 = vld [vmem:[%s4236_s26 + $0x68c] ss:$16 sps:$4 sm:$0xff]  }
 0x12b   : > { %1958 = vmatpush1.bf16.msra.mxu0 %v3547_v34  ;;  %2130 = vmatpush1.bf16.msra.mxu1 %v3550_v35  ;;  %v3637_v34 = vld [vmem:[%s4236_s26 + $0x680] ss:$16 sps:$4 sm:$0xff]   ;;  %v3640_v35 = vld [vmem:[%s4236_s26 + $0x688] ss:$16 sps:$4 sm:$0xff]  }
 0x12c   : > { %1959 = vmatprep.subr.bf16.mxu0 %v3555_v36  ;;  %2131 = vmatprep.subr.bf16.mxu1 %v3558_v37  ;;  %v3645_v36 = vld [vmem:[%s4236_s26 + $0x6a4] ss:$16 sps:$4 sm:$0xff]   ;;  %v3648_v37 = vld [vmem:[%s4236_s26 + $0x6ac] ss:$16 sps:$4 sm:$0xff]  }
 0x12f   : > { %1960 = vmatpush1.bf16.msra.mxu0 %v3553_v38  ;;  %2132 = vmatpush1.bf16.msra.mxu1 %v3556_v39  ;;  %v3643_v38 = vld [vmem:[%s4236_s26 + $0x6a0] ss:$16 sps:$4 sm:$0xff]   ;;  %v3646_v39 = vld [vmem:[%s4236_s26 + $0x6a8] ss:$16 sps:$4 sm:$0xff]  }
 0x130   : > { %1961 = vmatprep.subr.bf16.mxu0 %v3561_v40  ;;  %2133 = vmatprep.subr.bf16.mxu1 %v3564_v41  ;;  %v3651_v40 = vld [vmem:[%s4236_s26 + $0x6c4] ss:$16 sps:$4 sm:$0xff]   ;;  %v3654_v41 = vld [vmem:[%s4236_s26 + $0x6cc] ss:$16 sps:$4 sm:$0xff]  }
 0x133   : > { %1962 = vmatpush1.bf16.msra.mxu0 %v3559_v42  ;;  %2134 = vmatpush1.bf16.msra.mxu1 %v3562_v43  ;;  %v3649_v42 = vld [vmem:[%s4236_s26 + $0x6c0] ss:$16 sps:$4 sm:$0xff]   ;;  %v3652_v43 = vld [vmem:[%s4236_s26 + $0x6c8] ss:$16 sps:$4 sm:$0xff]  }
 0x134   : > { %1963 = vmatprep.subr.bf16.mxu0 %v3567_v44  ;;  %2135 = vmatprep.subr.bf16.mxu1 %v3570_v45  ;;  %v3657_v44 = vld [vmem:[%s4236_s26 + $0x6e4] ss:$16 sps:$4 sm:$0xff]   ;;  %v3660_v45 = vld [vmem:[%s4236_s26 + $0x6ec] ss:$16 sps:$4 sm:$0xff]  }
 0x137   : > { %1964 = vmatpush1.bf16.msra.mxu0 %v3565_v46  ;;  %2136 = vmatpush1.bf16.msra.mxu1 %v3568_v47  ;;  %v3655_v46 = vld [vmem:[%s4236_s26 + $0x6e0] ss:$16 sps:$4 sm:$0xff]   ;;  %v3658_v47 = vld [vmem:[%s4236_s26 + $0x6e8] ss:$16 sps:$4 sm:$0xff]  }
 0x138   : > { %1965 = vmatprep.subr.bf16.mxu0 %v3573_v48  ;;  %2137 = vmatprep.subr.bf16.mxu1 %v3576_v49  ;;  %v3663_v48 = vld [vmem:[%s4236_s26 + $0x704] ss:$16 sps:$4 sm:$0xff]   ;;  %v3666_v49 = vld [vmem:[%s4236_s26 + $0x70c] ss:$16 sps:$4 sm:$0xff]  }
 0x13b   : > { %1966 = vmatpush1.bf16.msra.mxu0 %v3571_v50  ;;  %2138 = vmatpush1.bf16.msra.mxu1 %v3574_v51  ;;  %v3661_v50 = vld [vmem:[%s4236_s26 + $0x700] ss:$16 sps:$4 sm:$0xff]   ;;  %v3664_v51 = vld [vmem:[%s4236_s26 + $0x708] ss:$16 sps:$4 sm:$0xff]  }
 0x13c   : > { %1967 = vmatprep.subr.bf16.mxu0 %v3579_v52  ;;  %2139 = vmatprep.subr.bf16.mxu1 %v3582_v53  ;;  %v3669_v52 = vld [vmem:[%s4236_s26 + $0x724] ss:$16 sps:$4 sm:$0xff]   ;;  %v3672_v53 = vld [vmem:[%s4236_s26 + $0x72c] ss:$16 sps:$4 sm:$0xff]  }
 0x13f   : > { %1968 = vmatpush1.bf16.msra.mxu0 %v3577_v54  ;;  %2140 = vmatpush1.bf16.msra.mxu1 %v3580_v55  ;;  %v3667_v54 = vld [vmem:[%s4236_s26 + $0x720] ss:$16 sps:$4 sm:$0xff]   ;;  %v3670_v55 = vld [vmem:[%s4236_s26 + $0x728] ss:$16 sps:$4 sm:$0xff]  }
 0x140   : > { %1969 = vmatprep.subr.bf16.mxu0 %v3585_v56  ;;  %2141 = vmatprep.subr.bf16.mxu1 %v3588_v57  ;;  %v3675_v56 = vld [vmem:[%s4236_s26 + $0x744] ss:$16 sps:$4 sm:$0xff]   ;;  %v3678_v57 = vld [vmem:[%s4236_s26 + $0x74c] ss:$16 sps:$4 sm:$0xff]  }
 0x143   : > { %1970 = vmatpush1.bf16.msra.mxu0 %v3583_v58  ;;  %2142 = vmatpush1.bf16.msra.mxu1 %v3586_v59  ;;  %v3673_v58 = vld [vmem:[%s4236_s26 + $0x740] ss:$16 sps:$4 sm:$0xff]   ;;  %v3676_v59 = vld [vmem:[%s4236_s26 + $0x748] ss:$16 sps:$4 sm:$0xff]  }
 0x144   : > { %1971 = vmatprep.subr.bf16.mxu0 %v3591_v60  ;;  %2143 = vmatprep.subr.bf16.mxu1 %v3594_v61  ;;  %v3681_v60 = vld [vmem:[%s4236_s26 + $0x764] ss:$16 sps:$4 sm:$0xff]   ;;  %v3684_v61 = vld [vmem:[%s4236_s26 + $0x76c] ss:$16 sps:$4 sm:$0xff]  }
 0x147   : > { %1972 = vmatpush1.bf16.msra.mxu0 %v3589_v62  ;;  %2144 = vmatpush1.bf16.msra.mxu1 %v3592_v63  ;;  %v3679_v62 = vld [vmem:[%s4236_s26 + $0x760] ss:$16 sps:$4 sm:$0xff]   ;;  %v3682_v63 = vld [vmem:[%s4236_s26 + $0x768] ss:$16 sps:$4 sm:$0xff]  }
 0x148   : > { %1973 = vmatprep.subr.bf16.mxu0 %v3597_v0  ;;  %2145 = vmatprep.subr.bf16.mxu1 %v3600_v1  ;;  %v3687_v0 = vld [vmem:[%s4236_s26 + $0x784] ss:$16 sps:$4 sm:$0xff]   ;;  %v3690_v1 = vld [vmem:[%s4236_s26 + $0x78c] ss:$16 sps:$4 sm:$0xff]  }
 0x14b   : > { %1974 = vmatpush1.bf16.msra.mxu0 %v3595_v2  ;;  %2146 = vmatpush1.bf16.msra.mxu1 %v3598_v3  ;;  %v3685_v2 = vld [vmem:[%s4236_s26 + $0x780] ss:$16 sps:$4 sm:$0xff]   ;;  %v3688_v3 = vld [vmem:[%s4236_s26 + $0x788] ss:$16 sps:$4 sm:$0xff]  }
 0x14c   : > { %1975 = vmatprep.subr.bf16.mxu0 %v3603_v4  ;;  %2147 = vmatprep.subr.bf16.mxu1 %v3606_v5  ;;  %v3693_v4 = vld [vmem:[%s4236_s26 + $0x7a4] ss:$16 sps:$4 sm:$0xff]   ;;  %v3696_v5 = vld [vmem:[%s4236_s26 + $0x7ac] ss:$16 sps:$4 sm:$0xff]  }
 0x14f   : > { %1976 = vmatpush1.bf16.msra.mxu0 %v3601_v6  ;;  %2148 = vmatpush1.bf16.msra.mxu1 %v3604_v7  ;;  %v3691_v6 = vld [vmem:[%s4236_s26 + $0x7a0] ss:$16 sps:$4 sm:$0xff]   ;;  %v3694_v7 = vld [vmem:[%s4236_s26 + $0x7a8] ss:$16 sps:$4 sm:$0xff]  }
 0x150   : > { %1977 = vmatprep.subr.bf16.mxu0 %v3609_v8  ;;  %2149 = vmatprep.subr.bf16.mxu1 %v3612_v9  ;;  %v3699_v8 = vld [vmem:[%s4236_s26 + $0x7c4] ss:$16 sps:$4 sm:$0xff]   ;;  %v3702_v9 = vld [vmem:[%s4236_s26 + $0x7cc] ss:$16 sps:$4 sm:$0xff]  }
 0x153   : > { %1978 = vmatpush1.bf16.msra.mxu0 %v3607_v10  ;;  %2150 = vmatpush1.bf16.msra.mxu1 %v3610_v11  ;;  %v3697_v10 = vld [vmem:[%s4236_s26 + $0x7c0] ss:$16 sps:$4 sm:$0xff]   ;;  %v3700_v11 = vld [vmem:[%s4236_s26 + $0x7c8] ss:$16 sps:$4 sm:$0xff]  }
 0x154   : > { %1990 = vmatprep.subr.bf16.mxu0 %v3615_v12  ;;  %2162 = vmatprep.subr.bf16.mxu1 %v3618_v13  ;;  %v3705_v12 = vld [vmem:[%s4236_s26 + $0x7e4] ss:$16 sps:$4 sm:$0xff]   ;;  %v3708_v13 = vld [vmem:[%s4236_s26 + $0x7ec] ss:$16 sps:$4 sm:$0xff]  }
 0x156   : > { %1980 = vmatmul.mubr.bf16.vlgmr.msra.gmra.mrb[0].mxu0 %v2830_v20  ;;  %2152 = vmatmul.mubr.bf16.vlgmr.msra.gmra.mrb[0].mxu1 %v2830_v20  ;;  %v2832_v20 = vcombine.low %v4460_v14, %v4462_v17  ;;  %v3714_v14 = vld [vmem:[%s4245_s4 + $0xc8] sm:$0xff]  }
 0x157   : > { %1991 = vmatpush1.bf16.msra.mxu0 %v3613_v18  ;;  %2163 = vmatpush1.bf16.msra.mxu1 %v3616_v19  ;;  %v3703_v18 = vld [vmem:[%s4236_s26 + $0x7e0] ss:$16 sps:$4 sm:$0xff]   ;;  %v3706_v19 = vld [vmem:[%s4236_s26 + $0x7e8] ss:$16 sps:$4 sm:$0xff]  }
 0x158   : > { %1992 = vmatprep.subr.bf16.mxu0 %v3621_v21  ;;  %2164 = vmatprep.subr.bf16.mxu1 %v3624_v22  ;;  %v3709_v21 = vld [vmem:[%s4245_s4 + $0x40] sm:$0xff]   ;;  %v3715_v17 = vld [vmem:[%s4245_s4 + $0x8] sm:$0xff]  }
 0x159   : > { %2022 = vmatprep.mubr.bf16.mxu0 %v2833_v23  ;;  %2194 = vmatprep.mubr.bf16.mxu1 %v2833_v23  ;;  %v3710_v22 = vld [vmem:[%s4245_s4 + $0xc0] sm:$0xff]  }
 0x15a   : > { %v3711_v23 = vld [vmem:[%s4245_s4] sm:$0xff]  }
 0x15b   : > { %1993 = vmatpush1.bf16.msra.mxu0 %v3619_v15  ;;  %2165 = vmatpush1.bf16.msra.mxu1 %v3622_v16  ;;  %v3712_v15 = vld [vmem:[%s4245_s4 + $0x80] sm:$0xff]   ;;  %v3713_v16 = vld [vmem:[%s4245_s4 + $0x48] sm:$0xff]  }
 0x15c   : > { %1994 = vmatprep.subr.bf16.mxu0 %v3627_v24  ;;  %2166 = vmatprep.subr.bf16.mxu1 %v3630_v25  ;;  %v3716_v24 = vld [vmem:[%s4245_s4 + $0x88] sm:$0xff]   ;;  %v3717_v25 = vld [vmem:[%s4245_s4 + $0x50] sm:$0xff]  }
 0x15f   : > { %1995 = vmatpush1.bf16.msra.mxu0 %v3625_v26  ;;  %2167 = vmatpush1.bf16.msra.mxu1 %v3628_v27  ;;  %v3718_v26 = vld [vmem:[%s4245_s4 + $0xd0] sm:$0xff]  }
 0x160   : > { %1996 = vmatprep.subr.bf16.mxu0 %v3633_v28  ;;  %2168 = vmatprep.subr.bf16.mxu1 %v3636_v29  ;;  %v3719_v27 = vld [vmem:[%s4245_s4 + $0x10] sm:$0xff]   ;;  %v3721_v29 = vld [vmem:[%s4245_s4 + $0x58] sm:$0xff]  }
 0x161   : > { %v3720_v28 = vld [vmem:[%s4245_s4 + $0x90] sm:$0xff]  }
 0x163   : > { %1997 = vmatpush1.bf16.msra.mxu0 %v3631_v30  ;;  %2169 = vmatpush1.bf16.msra.mxu1 %v3634_v31  ;;  %v3722_v30 = vld [vmem:[%s4245_s4 + $0xd8] sm:$0xff]  }
 0x164   : > { %1998 = vmatprep.subr.bf16.mxu0 %v3639_v32  ;;  %2170 = vmatprep.subr.bf16.mxu1 %v3642_v33  ;;  %v3723_v31 = vld [vmem:[%s4245_s4 + $0x18] sm:$0xff]   ;;  %v3725_v33 = vld [vmem:[%s4245_s4 + $0x60] sm:$0xff]  }
 0x165   : > { %v3724_v32 = vld [vmem:[%s4245_s4 + $0x98] sm:$0xff]  }
 0x167   : > { %1999 = vmatpush1.bf16.msra.mxu0 %v3637_v34  ;;  %2171 = vmatpush1.bf16.msra.mxu1 %v3640_v35  ;;  %v3726_v34 = vld [vmem:[%s4245_s4 + $0xe0] sm:$0xff]  }
 0x168   : > { %2000 = vmatprep.subr.bf16.mxu0 %v3645_v36  ;;  %2172 = vmatprep.subr.bf16.mxu1 %v3648_v37  ;;  %v3727_v35 = vld [vmem:[%s4245_s4 + $0x20] sm:$0xff]   ;;  %v3729_v37 = vld [vmem:[%s4245_s4 + $0x68] sm:$0xff]  }
 0x169   : > { %v3728_v36 = vld [vmem:[%s4245_s4 + $0xa0] sm:$0xff]  }
 0x16b   : > { %2001 = vmatpush1.bf16.msra.mxu0 %v3643_v38  ;;  %2173 = vmatpush1.bf16.msra.mxu1 %v3646_v39  ;;  %v3730_v38 = vld [vmem:[%s4245_s4 + $0xe8] sm:$0xff]  }
 0x16c   : > { %2002 = vmatprep.subr.bf16.mxu0 %v3651_v40  ;;  %2174 = vmatprep.subr.bf16.mxu1 %v3654_v41  ;;  %v3731_v39 = vld [vmem:[%s4245_s4 + $0x28] sm:$0xff]   ;;  %v3733_v41 = vld [vmem:[%s4245_s4 + $0x70] sm:$0xff]  }
 0x16d   : > { %v3732_v40 = vld [vmem:[%s4245_s4 + $0xa8] sm:$0xff]  }
 0x16f   : > { %2003 = vmatpush1.bf16.msra.mxu0 %v3649_v42  ;;  %2175 = vmatpush1.bf16.msra.mxu1 %v3652_v43  ;;  %v3734_v42 = vld [vmem:[%s4245_s4 + $0xf0] sm:$0xff]  }
 0x170   : > { %2004 = vmatprep.subr.bf16.mxu0 %v3657_v44  ;;  %2176 = vmatprep.subr.bf16.mxu1 %v3660_v45  ;;  %v3735_v43 = vld [vmem:[%s4245_s4 + $0x30] sm:$0xff]   ;;  %v3737_v45 = vld [vmem:[%s4245_s4 + $0x78] sm:$0xff]  }
 0x171   : > { %v3736_v44 = vld [vmem:[%s4245_s4 + $0xb0] sm:$0xff]  }
 0x173   : > { %2005 = vmatpush1.bf16.msra.mxu0 %v3655_v46  ;;  %2177 = vmatpush1.bf16.msra.mxu1 %v3658_v47  ;;  %v3738_v46 = vld [vmem:[%s4245_s4 + $0xf8] sm:$0xff]  }
 0x174   : > { %2006 = vmatprep.subr.bf16.mxu0 %v3663_v48  ;;  %2178 = vmatprep.subr.bf16.mxu1 %v3666_v49  ;;  %v3739_v47 = vld [vmem:[%s4245_s4 + $0x38] sm:$0xff]  }
 0x175   : > { %v3740_v48 = vld [vmem:[%s4245_s4 + $0xb8] sm:$0xff]  }
 0x177   : > { %2007 = vmatpush1.bf16.msra.mxu0 %v3661_v50  ;;  %2179 = vmatpush1.bf16.msra.mxu1 %v3664_v51 }
 0x178   : > { %2008 = vmatprep.subr.bf16.mxu0 %v3669_v52  ;;  %2180 = vmatprep.subr.bf16.mxu1 %v3672_v53 }
 0x17b   : > { %2009 = vmatpush1.bf16.msra.mxu0 %v3667_v54  ;;  %2181 = vmatpush1.bf16.msra.mxu1 %v3670_v55 }
 0x17c   : > { %2010 = vmatprep.subr.bf16.mxu0 %v3675_v56  ;;  %2182 = vmatprep.subr.bf16.mxu1 %v3678_v57 }
 0x17f   : > { %2011 = vmatpush1.bf16.msra.mxu0 %v3673_v58  ;;  %2183 = vmatpush1.bf16.msra.mxu1 %v3676_v59 }
 0x180   : > { %2012 = vmatprep.subr.bf16.mxu0 %v3681_v60  ;;  %2184 = vmatprep.subr.bf16.mxu1 %v3684_v61 }
 0x183   : > { %2013 = vmatpush1.bf16.msra.mxu0 %v3679_v62  ;;  %2185 = vmatpush1.bf16.msra.mxu1 %v3682_v63 }
 0x184   : > { %2014 = vmatprep.subr.bf16.mxu0 %v3687_v0  ;;  %2186 = vmatprep.subr.bf16.mxu1 %v3690_v1 }
 0x187   : > { %2015 = vmatpush1.bf16.msra.mxu0 %v3685_v2  ;;  %2187 = vmatpush1.bf16.msra.mxu1 %v3688_v3 }
 0x188   : > { %2016 = vmatprep.subr.bf16.mxu0 %v3693_v4  ;;  %2188 = vmatprep.subr.bf16.mxu1 %v3696_v5 }
 0x18b   : > { %2017 = vmatpush1.bf16.msra.mxu0 %v3691_v6  ;;  %2189 = vmatpush1.bf16.msra.mxu1 %v3694_v7 }
 0x18c   : > { %2018 = vmatprep.subr.bf16.mxu0 %v3699_v8  ;;  %2190 = vmatprep.subr.bf16.mxu1 %v3702_v9 }
 0x18f   : > { %2019 = vmatpush1.bf16.msra.mxu0 %v3697_v10  ;;  %2191 = vmatpush1.bf16.msra.mxu1 %v3700_v11 }
 0x190   : > { %2020 = vmatprep.subr.bf16.mxu0 %v3705_v12  ;;  %2192 = vmatprep.subr.bf16.mxu1 %v3708_v13 }
 0x193   : > { %2021 = vmatpush1.bf16.msra.mxu0 %v3703_v18  ;;  %2193 = vmatpush1.bf16.msra.mxu1 %v3706_v19 }
 0x194   : > { %3130 = vmatprep.subr.bf16.mxu0 %v3709_v21  ;;  %3152 = vmatprep.subr.bf16.mxu1 %v3710_v22 }
 0x196   : > { %2023 = vmatmul.mubr.bf16.vlgmr.msra.gmra.mrb[0].mxu0 %v2832_v20  ;;  %2195 = vmatmul.mubr.bf16.vlgmr.msra.gmra.mrb[0].mxu1 %v2832_v20 }
 0x197   : > { %3131 = vmatpush3.bf16.msra.mxu0 %v3711_v23  ;;  %3153 = vmatpush3.bf16.msra.mxu1 %v3712_v15 }
 0x198   : > { %3132 = vmatprep.subr.bf16.mxu0 %v3713_v16  ;;  %3154 = vmatprep.subr.bf16.mxu1 %v3714_v14 }
 0x19b   : > { %3133 = vmatpush3.bf16.msra.mxu0 %v3715_v17  ;;  %3155 = vmatpush3.bf16.msra.mxu1 %v3716_v24 }
 0x19c   : > { %3134 = vmatprep.subr.bf16.mxu0 %v3717_v25  ;;  %3156 = vmatprep.subr.bf16.mxu1 %v3718_v26 }
 0x19f   : > { %3135 = vmatpush3.bf16.msra.mxu0 %v3719_v27  ;;  %3157 = vmatpush3.bf16.msra.mxu1 %v3720_v28 }
 0x1a0   : > { %3136 = vmatprep.subr.bf16.mxu0 %v3721_v29  ;;  %3158 = vmatprep.subr.bf16.mxu1 %v3722_v30 }
 0x1a3   : > { %3137 = vmatpush3.bf16.msra.mxu0 %v3723_v31  ;;  %3159 = vmatpush3.bf16.msra.mxu1 %v3724_v32 }
 0x1a4   : > { %3138 = vmatprep.subr.bf16.mxu0 %v3725_v33  ;;  %3160 = vmatprep.subr.bf16.mxu1 %v3726_v34 }
 0x1a7   : > { %3139 = vmatpush3.bf16.msra.mxu0 %v3727_v35  ;;  %3161 = vmatpush3.bf16.msra.mxu1 %v3728_v36 }
 0x1a8   : > { %3140 = vmatprep.subr.bf16.mxu0 %v3729_v37  ;;  %3162 = vmatprep.subr.bf16.mxu1 %v3730_v38 }
 0x1ab   : > { %3141 = vmatpush3.bf16.msra.mxu0 %v3731_v39  ;;  %3163 = vmatpush3.bf16.msra.mxu1 %v3732_v40 }
 0x1ac   : > { %3142 = vmatprep.subr.bf16.mxu0 %v3733_v41  ;;  %3164 = vmatprep.subr.bf16.mxu1 %v3734_v42 }
 0x1af   : > { %3143 = vmatpush3.bf16.msra.mxu0 %v3735_v43  ;;  %3165 = vmatpush3.bf16.msra.mxu1 %v3736_v44 }
 0x1b0   : > { %3144 = vmatprep.subr.bf16.mxu0 %v3737_v45  ;;  %3166 = vmatprep.subr.bf16.mxu1 %v3738_v46 }
 0x1b3   : > { %3145 = vmatpush3.bf16.msra.mxu0 %v3739_v47  ;;  %3167 = vmatpush3.bf16.msra.mxu1 %v3740_v48 }
 0x269   : > { %v4564_v49 = vpop.f32.mrb[0].mxu0  ;;  %v4566_v50 = vpop.f32.mrb[0].mxu1 }
 0x26a   : > { %v4568_v51 = vpop.f32.mrb[1].mxu0  ;;  %v4570_v52 = vpop.f32.mrb[1].mxu1  ;;  %v2237_v53 = vmul.f32 %v4564_v49, %v4564_v49  ;;  %v2239_v54 = vmul.f32 %v4566_v50, %v4566_v50 }
 0x26b   : > { %v2238_v55 = vmul.f32 %v4568_v51, %v4568_v51  ;;  %v2240_v56 = vmul.f32 %v4570_v52, %v4570_v52  ;;  %v4580_v57 = vpop.f32.mrb[2].mxu0  ;;  %v4582_v58 = vpop.f32.mrb[2].mxu1 }
 0x26c   : > { %v2205_v59 = vadd.f32 %v4580_v57, %v4564_v49  ;;  %v2241_v60 = vmul.f32 %v4580_v57, %v4580_v57  ;;  %v2219_v61 = vadd.f32 %v4582_v58, %v4566_v50  ;;  %v2243_v62 = vmul.f32 %v4582_v58, %v4582_v58  ;;  %v4592_v63 = vpop.f32.mrb[3].mxu0  ;;  %v4594_v0 = vpop.f32.mrb[3].mxu1 }
 0x26d   : > { %v2212_v1 = vadd.f32 %v4592_v63, %v4568_v51  ;;  %v2242_v2 = vmul.f32 %v4592_v63, %v4592_v63  ;;  %v2226_v3 = vadd.f32 %v4594_v0, %v4570_v52  ;;  %v2244_v4 = vmul.f32 %v4594_v0, %v4594_v0 }
 0x26e   : > { %v2206_v5 = vrot.slane %v2205_v59, 4  ;;  %v2245_v6 = vadd.f32 %v2241_v60, %v2237_v53  ;;  %v2220_v7 = vrot.slane %v2219_v61, 4  ;;  %v2259_v8 = vadd.f32 %v2243_v62, %v2239_v54 }
 0x26f   : > { %v2213_v9 = vrot.slane %v2212_v1, 4  ;;  %v2252_v10 = vadd.f32 %v2242_v2, %v2238_v55  ;;  %v2227_v11 = vrot.slane %v2226_v3, 4  ;;  %v2266_v12 = vadd.f32 %v2244_v4, %v2240_v56 }
 0x270   : > { %v2207_v13 = vadd.f32 %v2206_v5, %v2205_v59  ;;  %v2246_v18 = vrot.slane %v2245_v6, 4  ;;  %v2221_v19 = vadd.f32 %v2220_v7, %v2219_v61  ;;  %v2260_v20 = vrot.slane %v2259_v8, 4 }
 0x271   : > { %v2214_v21 = vadd.f32 %v2213_v9, %v2212_v1  ;;  %v2253_v22 = vrot.slane %v2252_v10, 4  ;;  %v2228_v23 = vadd.f32 %v2227_v11, %v2226_v3  ;;  %v2267_v15 = vrot.slane %v2266_v12, 4 }
 0x272   : > { %v2208_v16 = vrot.slane %v2207_v13, 2  ;;  %v2247_v14 = vadd.f32 %v2246_v18, %v2245_v6  ;;  %v2222_v17 = vrot.slane %v2221_v19, 2  ;;  %v2261_v24 = vadd.f32 %v2260_v20, %v2259_v8 }
 0x273   : > { %v2215_v25 = vrot.slane %v2214_v21, 2  ;;  %v2254_v26 = vadd.f32 %v2253_v22, %v2252_v10  ;;  %v2229_v27 = vrot.slane %v2228_v23, 2  ;;  %v2268_v28 = vadd.f32 %v2267_v15, %v2266_v12 }
 0x274   : > { %v2209_v29 = vadd.f32 %v2208_v16, %v2207_v13  ;;  %v2248_v30 = vrot.slane %v2247_v14, 2  ;;  %v2223_v31 = vadd.f32 %v2222_v17, %v2221_v19  ;;  %v2262_v32 = vrot.slane %v2261_v24, 2 }
 0x275   : > { %v2216_v33 = vadd.f32 %v2215_v25, %v2214_v21  ;;  %v2255_v34 = vrot.slane %v2254_v26, 2  ;;  %v2230_v35 = vadd.f32 %v2229_v27, %v2228_v23  ;;  %v2269_v36 = vrot.slane %v2268_v28, 2 }
 0x276   : > { %v2210_v37 = vrot.slane %v2209_v29, 1  ;;  %v2249_v38 = vadd.f32 %v2248_v30, %v2247_v14  ;;  %v2224_v39 = vrot.slane %v2223_v31, 1  ;;  %v2263_v40 = vadd.f32 %v2262_v32, %v2261_v24 }
 0x277   : > { %v2217_v41 = vrot.slane %v2216_v33, 1  ;;  %v2256_v42 = vadd.f32 %v2255_v34, %v2254_v26  ;;  %v2231_v43 = vrot.slane %v2230_v35, 1  ;;  %v2270_v44 = vadd.f32 %v2269_v36, %v2268_v28 }
 0x278   : > { %v2211_v45 = vadd.f32 %v2210_v37, %v2209_v29  ;;  %v2250_v46 = vrot.slane %v2249_v38, 1  ;;  %v2225_v47 = vadd.f32 %v2224_v39, %v2223_v31  ;;  %v2264_v48 = vrot.slane %v2263_v40, 1 }
 0x279   : > { %v2218_v53 = vadd.f32 %v2217_v41, %v2216_v33  ;;  %v2257_v54 = vrot.slane %v2256_v42, 1  ;;  %v2232_v55 = vadd.f32 %v2231_v43, %v2230_v35  ;;  %v2271_v56 = vrot.slane %v2270_v44, 1 }
 0x27a   : > { %v2233_v59 = vmul.f32 0.25, %v2211_v45  ;;  %v2251_v60 = vadd.f32 %v2250_v46, %v2249_v38  ;;  %v2235_v61 = vmul.f32 0.25, %v2225_v47  ;;  %v2265_v62 = vadd.f32 %v2264_v48, %v2263_v40 }
 0x27b   : > { %v2234_v1 = vmul.f32 0.25, %v2218_v53  ;;  %v2258_v2 = vadd.f32 %v2257_v54, %v2256_v42  ;;  %v2236_v3 = vmul.f32 0.25, %v2232_v55  ;;  %v2272_v4 = vadd.f32 %v2271_v56, %v2270_v44 }
 0x27c   : > { %v2273_v5 = vmul.f32 0.25, %v2251_v60  ;;  %v2277_v6 = vmul.f32 %v2233_v59, %v2233_v59  ;;  %v2293_v7 = vsub.f32 %v4580_v57, %v2233_v59  ;;  %v2275_v8 = vmul.f32 0.25, %v2265_v62 }
 0x27d   : > { %v2279_v9 = vmul.f32 %v2235_v61, %v2235_v61  ;;  %v2295_v10 = vsub.f32 %v4582_v58, %v2235_v61  ;;  %v2274_v11 = vmul.f32 0.25, %v2258_v2  ;;  %v2278_v12 = vmul.f32 %v2234_v1, %v2234_v1  ;;  %v2321_v2 = vld [vmem:[%s4247_s27] sm:$0xff] }
 0x27e   : > { %v2281_v13 = vsub.f32 %v2273_v5, %v2277_v6  ;;  %v2294_v18 = vsub.f32 %v4592_v63, %v2234_v1  ;;  %v2276_v19 = vmul.f32 0.25, %v2272_v4  ;;  %v2280_v20 = vmul.f32 %v2236_v3, %v2236_v3 }
 0x27f   : > { %v2283_v21 = vsub.f32 %v2275_v8, %v2279_v9  ;;  %v2282_v22 = vsub.f32 %v2274_v11, %v2278_v12  ;;  %v2296_v23 = vsub.f32 %v4594_v0, %v2236_v3  ;;  %v2290_v15 = vsub.f32 %v4568_v51, %v2234_v1 }
 0x280   : > { %v2285_v16 = vmax.f32 %v2281_v13, 0.0  ;;  %v2284_v14 = vsub.f32 %v2276_v19, %v2280_v20  ;;  %v2292_v57 = vsub.f32 %v4570_v52, %v2236_v3  ;;  %v2289_v17 = vsub.f32 %v4564_v49, %v2233_v59 }
 0x281   : > { %v2287_v58 = vmax.f32 %v2283_v21, 0.0  ;;  %v2286_v24 = vmax.f32 %v2282_v22, 0.0  ;;  %v2291_v25 = vsub.f32 %v4566_v50, %v2235_v61 }
 0x282   : > { %v2297_v26 = vadd.f32 1e-05, %v2285_v16  ;;  %v2288_v63 = vmax.f32 %v2284_v14, 0.0 }
 0x283   : > { %v2299_v27 = vadd.f32 1e-05, %v2287_v58  ;;  %v2298_v28 = vadd.f32 1e-05, %v2286_v24 }
 0x284   : > { %3741 = vrsqrt.f32 %v2297_v26  ;;  %v2300_v29 = vadd.f32 1e-05, %v2288_v63 }
 0x285   : > { %3743 = vrsqrt.f32 %v2299_v27 }
 0x286   : > { %3745 = vrsqrt.f32 %v2298_v28 }
 0x287   : > { %3747 = vrsqrt.f32 %v2300_v29 }
 0x28e   : > { %v3742_v51 = vpop.eup %3741 }
 0x28f   : > { %v3744_v0 = vpop.eup %3743  ;;  %v2309_v30 = vmul.f32 %v3742_v51, %v2293_v7  ;;  %v2305_v31 = vmul.f32 %v3742_v51, %v2289_v17  ;;  %v2322_v7 = vld [vmem:[%s4247_s27 + $0x8] sm:$0xff] }
 0x290   : > { %v3746_v52 = vpop.eup %3745  ;;  %v2311_v32 = vmul.f32 %v3744_v0, %v2295_v10  ;;  %v2307_v49 = vmul.f32 %v3744_v0, %v2291_v25 }
 0x291   : > { %v3748_v33 = vpop.eup %3747  ;;  %v2317_v34 = vmax.f32 %v2309_v30, 0.0  ;;  %v2310_v35 = vmul.f32 %v3746_v52, %v2294_v18  ;;  %v2306_v50 = vmul.f32 %v3746_v52, %v2290_v15  ;;  %v2313_v36 = vmax.f32 %v2305_v31, 0.0 }
 0x292   : > { %v2319_v37 = vmax.f32 %v2311_v32, 0.0  ;;  %v2312_v38 = vmul.f32 %v3748_v33, %v2296_v23  ;;  %v2308_v39 = vmul.f32 %v3748_v33, %v2292_v57  ;;  %v2315_v40 = vmax.f32 %v2307_v49, 0.0 }
 0x293   : > { %v2314_v41 = vmax.f32 %v2306_v50, 0.0  ;;  %v2318_v42 = vmax.f32 %v2310_v35, 0.0  ;;  %v2323_v43 = vpack.c.bf16 %v2317_v34, %v2313_v36 }
 0x294   : > { %v2316_v44 = vmax.f32 %v2308_v39, 0.0  ;;  %v2320_v45 = vmax.f32 %v2312_v38, 0.0  ;;  %v2325_v46 = vpack.c.bf16 %v2319_v37, %v2315_v40 }
 0x295   : > { %v2324_v47 = vpack.c.bf16 %v2318_v42, %v2314_v41 }
 0x296   : > { %v2326_v48 = vpack.c.bf16 %v2320_v45, %v2316_v44 }
 0x297   : > { %2615 = vmatprep.mubr.bf16.mxu0 %v2324_v47 }
 0x298   : > { %2656 = vmatprep.mubr.bf16.mxu1 %v2326_v48  ;;  %2616 = vmatmul.mubr.bf16.vlgmr.msra.gmra.mrb[4].mxu0 %v2323_v43 }
 0x299   : > { %2657 = vmatmul.mubr.bf16.vlgmr.msra.gmra.mrb[4].mxu1 %v2325_v46 }
 0x36b   : > { %v3146_v53 = vpop.f32.mrb[4].mxu0 }
 0x36c   : > { %v3168_v54 = vpop.f32.mrb[4].mxu1  ;;  %v3147_v55 = vpop.f32.mrb[5].mxu0 }
 0x36d   : > { %v3148_v56 = vadd.f32 %v3147_v55, %v3146_v53  ;;  %v3169_v59 = vpop.f32.mrb[5].mxu1  ;;  %v3149_v60 = vpop.f32.mrb[6].mxu0 }
 0x36e   : > { %v3170_v61 = vadd.f32 %v3169_v59, %v3168_v54  ;;  %v3171_v62 = vpop.f32.mrb[6].mxu1  ;;  %v3150_v1 = vpop.f32.mrb[7].mxu0 }
 0x36f   : > { %v3151_v3 = vadd.f32 %v3150_v1, %v3149_v60  ;;  %v3172_v4 = vpop.f32.mrb[7].mxu1 }
 0x370   : > { %v2659_v5 = vadd.f32 %v3170_v61, %v3148_v56  ;;  %v3173_v6 = vadd.f32 %v3172_v4, %v3171_v62 }
 0x372   : > { %v2665_v8 = vadd.f32 %v2659_v5, %v2321_v2  ;;  %v2662_v9 = vadd.f32 %v3173_v6, %v3151_v3 }
 0x374   : > { %2667 = vst [vmem:[%s4247_s27] sm:$0xff] %v2665_v8  ;;  %v2666_v10 = vadd.f32 %v2662_v9, %v2322_v7 }
 0x376   : > { %2668 = vst [vmem:[%s4247_s27 + $0x8] sm:$0xff] %v2666_v10 }
 0x377   : > { %3850 = shalt.err (!%p3847_p8)
}
 0x378   : > { %s3851_s11 = scalar_lea.hbm %s4619_s25, 256  ;;  %s3855_s7 = scalar_lea.hbm %s4729_s8, 512 }
 0x379   : > { %p3852_p1 = scmp.ne.s32.totalorder %s4619_s25, %s3851_s11  ;;  %p3856_p9 = scmp.lt.u32.totalorder %s4619_s25, %s4729_s8 }
 0x37a   : > { %p3857_p11 = scmp.lt.u32.totalorder %s3855_s7, %s3851_s11  ;;  %p3859_p13 = scmp.lt.u32.totalorder %s3851_s11, %s4619_s25 }
 0x37b   : > { %p3853_p7 = pnand %p3852_p1, %p4730_p3 }
 0x37c   : > { %p3858_p2 = por %p3857_p11, %p3856_p9 }
 0x37d   : > { %p3854_p12 = pneg %p3853_p7 }
 0x37e   : > { %p3860_p0 = por %p3859_p13, %p3858_p2 }
 0x380   : > { %p3861_p6 = pnand %p3860_p0, %p3854_p12 }
 0x382   : > { %3864 = shalt.err (!%p3861_p6)
}
 0x383   : > { %s3976_s6 = smov 128   ;;  %s3977_s20 = smov 8  }
 0x384   : > { %3206 = dma.vmem_to_hbm [thread:$0]  (%p4730_p3), %s4621_s29, 256, %s4619_s25, %s4627_s21, %s3976_s6, %s3976_s6, %s3977_s20  }
 0x385 PF: > { %p3226_p10 = scmp.ge.s32.totalorder %s3963_s22, 2  ;;  %s2698_s4 = sand.u32 1, %s3923_s12  }
 0x386   : > { %p4731_p5 = scmp.ne.s32.totalorder %s4719_s15, 0  ;;  %s2699_s27 = scalar_lea.sflag [#allocation4], %s2698_s4 }
 0x388   : > { %p3220_p4 = pnand %p3226_p10, %p4731_p5 }
 0x38a   : > { %3918 = dma.done.wait (!%p3220_p4), %s2699_s27, 256  }
 0x38b   : > { %3920 = vsyncadd (!%p3220_p4), %s2699_s27, 4294967040  ;;  %s20_s22 = sadd.s32 1, %s3963_s22   ;;  %s4732_s5 = sld [smem:[#allocation12_spill]] }
 0x38c   : > { %p17_p8 = scmp.ge.s32.totalorder %s20_s22, 6   ;;  %s4733_s17 = sld [smem:[#allocation17_spill]] }
 0x38d   : > { %s4734_s18 = sld [smem:[#allocation13_spill]]  ;;  %s4735_s19 = sld [smem:[#allocation14_spill]] }
 0x38e   : > { %s4736_s20 = sld [smem:[#allocation15_spill]]  ;;  %s4737_s21 = sld [smem:[#allocation16_spill]] }
 0x38f   : > { %s4738_s12 = smov %s3927_s13  ;;  %s4739_s13 = smov %s3931_s14 }
 0x390   : > { %s4740_s14 = smov %s4154_s3  ;;  %s4741_s15 = smov %s3939_s16 }
 0x391   : > { %s4742_s16 = smov %s4732_s5  ;;  %19 = sbr.rel (!%p17_p8) target bundleno = 13 (0xd), region = 97 }
 0x398   :  { %2704 = vsyncpa [#allocation3], 1 }
 0x399   :  { %2706 = vsyncpa [#allocation3 + $0x1], 1 }
 0x39a   :  { %2707 = vsyncpa [#allocation6], 1 }
 0x39b   :  { %2709 = vsyncpa [#allocation6 + $0x1], 1 }
 0x39c   :  { %2710 = vsyncpa [#allocation4], 1 }
 0x39d   :  { %2712 = vsyncpa [#allocation4 + $0x1], 1 }

</bundles_post_ra>
